<compile_context>
chip_gen: v7x
topology: tpu7x:2x2x1
jax: 0.10.0
libtpu: 0.0.40
codegen_flags: <defaults>
</compile_context>

<pallas_src>
import functools
import math

import jax
import jax.numpy as jnp
import numpy as np
from jax.experimental import pallas as pl
from jax.experimental.pallas import tpu as pltpu

NEG_SLOPE = 0.1


def _rb_kernel(x_ref, w1_ref, b1_ref, w2_ref, b2_ref, o_ref, mid_ref, *,
               hh, wp, cc, cr):
    """Fused residual block for one batch element.

    x_ref  : (1, H+2, Wp+1, 2C) f32  zero-padded input, column pairs on lanes
             (packed col p: lanes [0,C) = unpadded col 2p-1, [C,2C) = col 2p)
    w*_ref : (3, 4C, 2C)        bf16 per-row-tap im2col weight matrices
    b*_ref : (1, 2C)            f32
    o_ref  : (1, H, Wp, 2C)     f32  output packing: col w = (2w, 2w+1)
    mid_ref: (H+2, Wp+1, 2C)    f32  SAME-padded lrelu(conv1), packed like x_ref
    """
    c2 = 2 * cc
    wpin = wp + 1

    def conv(load_rows, w_ref, b_ref, r0, n):
        # load_rows(r, n) -> (n, wpin, 2C) f32 rows r .. r+n-1 of a padded source
        acc = None
        for dy in range(3):
            win = load_rows(r0 + dy, n)
            # K-fold the 4 padded columns covering output cols (2w, 2w+1):
            # concat of packed cols w and w+1 -> last dim 4C (= 256 for C=64)
            lhs = jnp.concatenate([win[:, 0:wp, :], win[:, 1:wpin, :]], axis=-1)
            lhs = lhs.reshape(n * wp, 4 * cc).astype(jnp.bfloat16)
            p = jnp.dot(lhs, w_ref[dy], preferred_element_type=jnp.float32)
            acc = p if acc is None else acc + p
        return acc + b_ref[...]                       # (n*wp, 2C) f32

    load_x = lambda r, n: x_ref[0, r:r + n, :, :]
    load_m = lambda r, n: mid_ref[r:r + n, :, :]

    zc = jnp.zeros((cr, 1, c2), jnp.float32)
    lane = jax.lax.broadcasted_iota(jnp.int32, (cr * wp, c2), 1)

    # ---- conv1 + LeakyReLU -> SAME-padded, column-packed intermediate ----
    for r0 in range(0, hh, cr):
        a1 = conv(load_x, w1_ref, b1_ref, r0, cr)          # (cr*wp, 2C) f32
        a1 = jnp.where(a1 >= 0, a1, NEG_SLOPE * a1).reshape(cr, wp, c2)
        rows = slice(r0 + 1, r0 + 1 + cr)
        # realign output packing (2w, 2w+1) -> padded packing (2p-1, 2p)
        mid_ref[rows, 0:1, :] = zc                          # col -1 pad (then hi half overwritten)
        mid_ref[rows, wp:wpin, :] = zc                      # col  W pad (then lo half overwritten)
        mid_ref[rows, 1:wpin, 0:cc] = a1[:, :, cc:]         # odd cols  -> lo lane half
        mid_ref[rows, 0:wp, cc:c2] = a1[:, :, 0:cc]         # even cols -> hi lane half
    # SAME row padding of the intermediate (rows -1 and H)
    zr = jnp.zeros((1, wpin, c2), jnp.float32)
    mid_ref[0:1, :, :] = zr
    mid_ref[hh + 1:hh + 2, :, :] = zr

    # ---- conv2 + identity, lane-dense output stores ----
    for r0 in range(0, hh, cr):
        a2 = conv(load_m, w2_ref, b2_ref, r0, cr)           # (cr*wp, 2C) f32
        xw = x_ref[0, r0 + 1:r0 + 1 + cr, 0:wp, :].reshape(cr * wp, c2)
        xv = x_ref[0, r0 + 1:r0 + 1 + cr, 1:wpin, :].reshape(cr * wp, c2)
        # identity in output packing: lanes [0,C)=col 2w, [C,2C)=col 2w+1
        # (half-lane swizzle via VPU select + XLU lane roll; keeps the store dense)
        ident = pltpu.roll(jnp.where(lane >= cc, xw, xv), shift=cc, axis=1)
        res = (ident + a2).reshape(cr, wp, c2)
        o_ref[0, r0:r0 + cr, :, :] = res.astype(o_ref.dtype)


def residual_block(x_nchw, w1_oihw, b1, w2_oihw, b2):
    """x: (N, C, H, W); w*: (C, C, 3, 3) OIHW; b*: (C,). Returns (N, C, H, W)."""
    N, C, H, W = x_nchw.shape
    assert W % 2 == 0, "column lane-packing requires even W"
    # (W % 16 == 0 additionally keeps the in-kernel reshapes copy-free; W=16 ok)
    Wp = W // 2
    C2 = 2 * C

    x_nhwc = jnp.transpose(x_nchw, (0, 2, 3, 1)).astype(jnp.float32)
    # pad once (1 row / 1 col each side) and fold column pairs into lanes
    x_pp = jnp.pad(x_nhwc, ((0, 0), (1, 1), (1, 1), (0, 0)))
    x_pp = x_pp.reshape(N, H + 2, Wp + 1, C2)

    def pack_w(w_oihw):
        # OIHW -> (ky, kx, Cin, Cout), then fold the 3 column taps of the two
        # packed output columns into a (4*Cin, 2*Cout) im2col matrix per ky.
        wt = jnp.transpose(w_oihw, (2, 3, 1, 0)).astype(jnp.float32)
        wb = jnp.zeros((3, 4, C, 2, C), jnp.float32)
        for j in range(4):          # LHS block j = padded input col 2w + j
            for ob in range(2):     # output col 2w + ob
                dx = j - ob
                if 0 <= dx <= 2:
                    wb = wb.at[:, j, :, ob, :].set(wt[:, dx])
        return wb.reshape(3, 4 * C, C2).astype(jnp.bfloat16)

    w1p = pack_w(w1_oihw)
    w2p = pack_w(w2_oihw)
    b1p = jnp.tile(b1.astype(jnp.float32), 2).reshape(1, C2)
    b2p = jnp.tile(b2.astype(jnp.float32), 2).reshape(1, C2)

    # largest row chunk dividing H that keeps the f32 accumulator <= (256, 2C)
    cr = 1
    for d in range(H, 0, -1):
        if H % d == 0 and d * Wp <= 256:
            cr = d
            break

    kernel = functools.partial(_rb_kernel, hh=H, wp=Wp, cc=C, cr=cr)

    out = pl.pallas_call(
        kernel,
        out_shape=jax.ShapeDtypeStruct((N, H, Wp, C2), jnp.float32),
        grid_spec=pltpu.PrefetchScalarGridSpec(
            num_scalar_prefetch=0,
            grid=(N,),
            in_specs=[
                pl.BlockSpec((1, H + 2, Wp + 1, C2), lambda n: (n, 0, 0, 0)),  # x (packed, padded)
                pl.BlockSpec((3, 4 * C, C2), lambda n: (0, 0, 0)),             # w1 (VMEM-resident)
                pl.BlockSpec((1, C2), lambda n: (0, 0)),                       # b1
                pl.BlockSpec((3, 4 * C, C2), lambda n: (0, 0, 0)),             # w2 (VMEM-resident)
                pl.BlockSpec((1, C2), lambda n: (0, 0)),                       # b2
            ],
            out_specs=pl.BlockSpec((1, H, Wp, C2), lambda n: (n, 0, 0, 0)),
            scratch_shapes=[
                pltpu.VMEM((H + 2, Wp + 1, C2), jnp.float32),  # padded lrelu(conv1)
            ],
        ),
        compiler_params=pltpu.CompilerParams(
            dimension_semantics=("parallel",),
            vmem_limit_bytes=32 * 1024 * 1024,
        ),
    )(x_pp, w1p, b1p, w2p, b2p)

    out = out.reshape(N, H, W, C)
    return jnp.transpose(out, (0, 3, 1, 2))


# ---------------- pure-JAX reference (sanity check only) ----------------
def _conv2d_ref(x_nchw, w_oihw, b):
    y = jax.lax.conv_general_dilated(
        x_nchw, w_oihw, window_strides=(1, 1), padding="SAME",
        dimension_numbers=("NCHW", "OIHW", "NCHW"))
    return y + b[None, :, None, None]


def residual_block_ref(x, w1, b1, w2, b2):
    h = _conv2d_ref(x, w1, b1)
    h = jnp.where(h >= 0, h, NEG_SLOPE * h)
    h = _conv2d_ref(h, w2, b2)
    return x + h


if __name__ == "__main__":
    # shapes consistent with the module (num_feat=64 default)
    N, C, H, W = 2, 64, 16, 16
    key = jax.random.PRNGKey(0)
    k1, k2, k3, k4, k5 = jax.random.split(key, 5)

    x = jax.random.normal(k1, (N, C, H, W), jnp.float32)

    fan_in = C * 3 * 3
    scale = 1.0 / math.sqrt(fan_in)
    w1 = jax.random.normal(k2, (C, C, 3, 3), jnp.float32) * scale
    b1 = jax.random.normal(k3, (C,), jnp.float32) * 0.01
    w2 = jax.random.normal(k4, (C, C, 3, 3), jnp.float32) * scale
    b2 = jax.random.normal(k5, (C,), jnp.float32) * 0.01

    out = jax.block_until_ready(residual_block(x, w1, b1, w2, b2))
    ref = residual_block_ref(x, w1, b1, w2, b2)

    assert out.shape == (N, C, H, W)
    err = float(np.max(np.abs(np.asarray(out) - np.asarray(ref))))
    # bf16 MXU operands with f32 accumulation => ~1e-2 level error vs f32 reference
    assert np.allclose(np.asarray(out), np.asarray(ref), atol=5e-2, rtol=5e-2), err

    print("KERNEL_OK")
</pallas_src>

<mosaic_0001>
module attributes {stable_mosaic.version = 11 : i64} {
  func.func @_rb_kernel(%arg0: i32, %arg1: memref<1x18x9x128xf32, #tpu.memory_space<vmem>>, %arg2: memref<3x256x128xbf16, #tpu.memory_space<vmem>>, %arg3: memref<1x128xf32, #tpu.memory_space<vmem>>, %arg4: memref<3x256x128xbf16, #tpu.memory_space<vmem>>, %arg5: memref<1x128xf32, #tpu.memory_space<vmem>>, %arg6: memref<1x16x8x128xf32, #tpu.memory_space<vmem>>, %arg7: memref<18x9x128xf32, #tpu.memory_space<vmem>>) attributes {dimension_semantics = [#tpu.dimension_semantics<parallel>], iteration_bounds = array<i64: 2>, scalar_prefetch = 0 : i64, scratch_operands = 1 : i64, tpu.core_type = #tpu.core_type<tc>, window_params = [{transform_indices = @transform_0, window_bounds = array<i64: 1, 18, 9, 128>}, {pipeline_mode = #tpu.pipeline_mode<synchronous>, transform_indices = @transform_1, window_bounds = array<i64: 3, 256, 128>}, {pipeline_mode = #tpu.pipeline_mode<synchronous>, transform_indices = @transform_2, window_bounds = array<i64: 1, 128>}, {pipeline_mode = #tpu.pipeline_mode<synchronous>, transform_indices = @transform_3, window_bounds = array<i64: 3, 256, 128>}, {pipeline_mode = #tpu.pipeline_mode<synchronous>, transform_indices = @transform_4, window_bounds = array<i64: 1, 128>}, {transform_indices = @transform_5, window_bounds = array<i64: 1, 16, 8, 128>}]} {
    %cst = arith.constant 0.000000e+00 : f32
    %0 = vector.broadcast %cst : f32 to vector<16x1x128xf32>
    %1 = tpu.iota {dimensions = array<i32: 1>} : vector<128x128xi32>
    %c0 = arith.constant 0 : index
    %c0_0 = arith.constant 0 : index
    %c0_1 = arith.constant 0 : index
    %c0_2 = arith.constant 0 : index
    %2 = vector.load %arg1[%c0, %c0_0, %c0_1, %c0_2] : memref<1x18x9x128xf32, #tpu.memory_space<vmem>>, vector<1x16x9x128xf32>
    %3 = vector.shape_cast %2 : vector<1x16x9x128xf32> to vector<16x9x128xf32>
    %4 = vector.extract_strided_slice %3 {offsets = [0, 0, 0], sizes = [16, 8, 128], strides = [1, 1, 1]} : vector<16x9x128xf32> to vector<16x8x128xf32>
    %5 = vector.extract_strided_slice %3 {offsets = [0, 1, 0], sizes = [16, 8, 128], strides = [1, 1, 1]} : vector<16x9x128xf32> to vector<16x8x128xf32>
    %6 = tpu.concatenate %4, %5 in 2 : vector<16x8x128xf32>, vector<16x8x128xf32> -> vector<16x8x256xf32>
    %7 = vector.shape_cast %6 : vector<16x8x256xf32> to vector<128x256xf32>
    %8 = arith.truncf %7 : vector<128x256xf32> to vector<128x256xbf16>
    %c0_3 = arith.constant 0 : index
    %c0_4 = arith.constant 0 : index
    %c0_5 = arith.constant 0 : index
    %9 = vector.load %arg2[%c0_3, %c0_4, %c0_5] : memref<3x256x128xbf16, #tpu.memory_space<vmem>>, vector<1x256x128xbf16>
    %10 = vector.shape_cast %9 : vector<1x256x128xbf16> to vector<256x128xbf16>
    %cst_6 = arith.constant dense<0.000000e+00> : vector<128x128xf32>
    %11 = tpu.matmul %8, %10, %cst_6 {dimension_numbers = #tpu.dot_dimension_numbers<[1], [0], [0], [1], [0, 0, 1, 1], [], []>} : vector<128x256xbf16>, vector<256x128xbf16>, vector<128x128xf32> -> vector<128x128xf32>
    %c0_7 = arith.constant 0 : index
    %c1 = arith.constant 1 : index
    %c0_8 = arith.constant 0 : index
    %c0_9 = arith.constant 0 : index
    %12 = vector.load %arg1[%c0_7, %c1, %c0_8, %c0_9] : memref<1x18x9x128xf32, #tpu.memory_space<vmem>>, vector<1x16x9x128xf32>
    %13 = vector.shape_cast %12 : vector<1x16x9x128xf32> to vector<16x9x128xf32>
    %14 = vector.extract_strided_slice %13 {offsets = [0, 0, 0], sizes = [16, 8, 128], strides = [1, 1, 1]} : vector<16x9x128xf32> to vector<16x8x128xf32>
    %15 = vector.extract_strided_slice %13 {offsets = [0, 1, 0], sizes = [16, 8, 128], strides = [1, 1, 1]} : vector<16x9x128xf32> to vector<16x8x128xf32>
    %16 = tpu.concatenate %14, %15 in 2 : vector<16x8x128xf32>, vector<16x8x128xf32> -> vector<16x8x256xf32>
    %17 = vector.shape_cast %16 : vector<16x8x256xf32> to vector<128x256xf32>
    %18 = arith.truncf %17 : vector<128x256xf32> to vector<128x256xbf16>
    %c1_10 = arith.constant 1 : index
    %c0_11 = arith.constant 0 : index
    %c0_12 = arith.constant 0 : index
    %19 = vector.load %arg2[%c1_10, %c0_11, %c0_12] : memref<3x256x128xbf16, #tpu.memory_space<vmem>>, vector<1x256x128xbf16>
    %20 = vector.shape_cast %19 : vector<1x256x128xbf16> to vector<256x128xbf16>
    %cst_13 = arith.constant dense<0.000000e+00> : vector<128x128xf32>
    %21 = tpu.matmul %18, %20, %cst_13 {dimension_numbers = #tpu.dot_dimension_numbers<[1], [0], [0], [1], [0, 0, 1, 1], [], []>} : vector<128x256xbf16>, vector<256x128xbf16>, vector<128x128xf32> -> vector<128x128xf32>
    %22 = arith.addf %11, %21 : vector<128x128xf32>
    %c0_14 = arith.constant 0 : index
    %c2 = arith.constant 2 : index
    %c0_15 = arith.constant 0 : index
    %c0_16 = arith.constant 0 : index
    %23 = vector.load %arg1[%c0_14, %c2, %c0_15, %c0_16] : memref<1x18x9x128xf32, #tpu.memory_space<vmem>>, vector<1x16x9x128xf32>
    %24 = vector.shape_cast %23 : vector<1x16x9x128xf32> to vector<16x9x128xf32>
    %25 = vector.extract_strided_slice %24 {offsets = [0, 0, 0], sizes = [16, 8, 128], strides = [1, 1, 1]} : vector<16x9x128xf32> to vector<16x8x128xf32>
    %26 = vector.extract_strided_slice %24 {offsets = [0, 1, 0], sizes = [16, 8, 128], strides = [1, 1, 1]} : vector<16x9x128xf32> to vector<16x8x128xf32>
    %27 = tpu.concatenate %25, %26 in 2 : vector<16x8x128xf32>, vector<16x8x128xf32> -> vector<16x8x256xf32>
    %28 = vector.shape_cast %27 : vector<16x8x256xf32> to vector<128x256xf32>
    %29 = arith.truncf %28 : vector<128x256xf32> to vector<128x256xbf16>
    %c2_17 = arith.constant 2 : index
    %c0_18 = arith.constant 0 : index
    %c0_19 = arith.constant 0 : index
    %30 = vector.load %arg2[%c2_17, %c0_18, %c0_19] : memref<3x256x128xbf16, #tpu.memory_space<vmem>>, vector<1x256x128xbf16>
    %31 = vector.shape_cast %30 : vector<1x256x128xbf16> to vector<256x128xbf16>
    %cst_20 = arith.constant dense<0.000000e+00> : vector<128x128xf32>
    %32 = tpu.matmul %29, %31, %cst_20 {dimension_numbers = #tpu.dot_dimension_numbers<[1], [0], [0], [1], [0, 0, 1, 1], [], []>} : vector<128x256xbf16>, vector<256x128xbf16>, vector<128x128xf32> -> vector<128x128xf32>
    %33 = arith.addf %22, %32 : vector<128x128xf32>
    %c0_21 = arith.constant 0 : index
    %c0_22 = arith.constant 0 : index
    %34 = vector.load %arg3[%c0_21, %c0_22] : memref<1x128xf32, #tpu.memory_space<vmem>>, vector<1x128xf32>
    %35 = vector.broadcast %34 : vector<1x128xf32> to vector<128x128xf32>
    %36 = arith.addf %33, %35 : vector<128x128xf32>
    %cst_23 = arith.constant 0.000000e+00 : f32
    %37 = vector.broadcast %cst_23 : f32 to vector<128x128xf32>
    %38 = arith.cmpf oge, %36, %37 : vector<128x128xf32>
    %cst_24 = arith.constant 1.000000e-01 : f32
    %39 = vector.broadcast %cst_24 : f32 to vector<128x128xf32>
    %40 = arith.mulf %39, %36 : vector<128x128xf32>
    %41 = arith.select %38, %36, %40 : vector<128x128xi1>, vector<128x128xf32>
    %42 = vector.shape_cast %41 : vector<128x128xf32> to vector<16x8x128xf32>
    %c1_25 = arith.constant 1 : index
    %c0_26 = arith.constant 0 : index
    %c0_27 = arith.constant 0 : index
    %43 = vector.load %arg7[%c1_25, %c0_26, %c0_27] : memref<18x9x128xf32, #tpu.memory_space<vmem>>, vector<16x1x128xf32>
    tpu.vector_store %arg7[%c1_25, %c0_26, %c0_27], %0 {strides = array<i32>} : memref<18x9x128xf32, #tpu.memory_space<vmem>>, vector<16x1x128xf32>,
    %c1_28 = arith.constant 1 : index
    %c8 = arith.constant 8 : index
    %c0_29 = arith.constant 0 : index
    %44 = vector.load %arg7[%c1_28, %c8, %c0_29] : memref<18x9x128xf32, #tpu.memory_space<vmem>>, vector<16x1x128xf32>
    tpu.vector_store %arg7[%c1_28, %c8, %c0_29], %0 {strides = array<i32>} : memref<18x9x128xf32, #tpu.memory_space<vmem>>, vector<16x1x128xf32>,
    %45 = vector.extract_strided_slice %42 {offsets = [0, 0, 64], sizes = [16, 8, 64], strides = [1, 1, 1]} : vector<16x8x128xf32> to vector<16x8x64xf32>
    %c1_30 = arith.constant 1 : index
    %c1_31 = arith.constant 1 : index
    %c0_32 = arith.constant 0 : index
    %46 = vector.load %arg7[%c1_30, %c1_31, %c0_32] : memref<18x9x128xf32, #tpu.memory_space<vmem>>, vector<16x8x64xf32>
    tpu.vector_store %arg7[%c1_30, %c1_31, %c0_32], %45 {strides = array<i32>} : memref<18x9x128xf32, #tpu.memory_space<vmem>>, vector<16x8x64xf32>,
    %47 = vector.extract_strided_slice %42 {offsets = [0, 0, 0], sizes = [16, 8, 64], strides = [1, 1, 1]} : vector<16x8x128xf32> to vector<16x8x64xf32>
    %c1_33 = arith.constant 1 : index
    %c0_34 = arith.constant 0 : index
    %c64 = arith.constant 64 : index
    %48 = vector.load %arg7[%c1_33, %c0_34, %c64] : memref<18x9x128xf32, #tpu.memory_space<vmem>>, vector<16x8x64xf32>
    tpu.vector_store %arg7[%c1_33, %c0_34, %c64], %47 {strides = array<i32>} : memref<18x9x128xf32, #tpu.memory_space<vmem>>, vector<16x8x64xf32>,
    %cst_35 = arith.constant 0.000000e+00 : f32
    %49 = vector.broadcast %cst_35 : f32 to vector<1x9x128xf32>
    %c0_36 = arith.constant 0 : index
    %c0_37 = arith.constant 0 : index
    %c0_38 = arith.constant 0 : index
    %50 = vector.load %arg7[%c0_36, %c0_37, %c0_38] : memref<18x9x128xf32, #tpu.memory_space<vmem>>, vector<1x9x128xf32>
    tpu.vector_store %arg7[%c0_36, %c0_37, %c0_38], %49 {strides = array<i32>} : memref<18x9x128xf32, #tpu.memory_space<vmem>>, vector<1x9x128xf32>,
    %c17 = arith.constant 17 : index
    %c0_39 = arith.constant 0 : index
    %c0_40 = arith.constant 0 : index
    %51 = vector.load %arg7[%c17, %c0_39, %c0_40] : memref<18x9x128xf32, #tpu.memory_space<vmem>>, vector<1x9x128xf32>
    tpu.vector_store %arg7[%c17, %c0_39, %c0_40], %49 {strides = array<i32>} : memref<18x9x128xf32, #tpu.memory_space<vmem>>, vector<1x9x128xf32>,
    %c0_41 = arith.constant 0 : index
    %c0_42 = arith.constant 0 : index
    %c0_43 = arith.constant 0 : index
    %52 = vector.load %arg7[%c0_41, %c0_42, %c0_43] : memref<18x9x128xf32, #tpu.memory_space<vmem>>, vector<16x9x128xf32>
    %53 = vector.extract_strided_slice %52 {offsets = [0, 0, 0], sizes = [16, 8, 128], strides = [1, 1, 1]} : vector<16x9x128xf32> to vector<16x8x128xf32>
    %54 = vector.extract_strided_slice %52 {offsets = [0, 1, 0], sizes = [16, 8, 128], strides = [1, 1, 1]} : vector<16x9x128xf32> to vector<16x8x128xf32>
    %55 = tpu.concatenate %53, %54 in 2 : vector<16x8x128xf32>, vector<16x8x128xf32> -> vector<16x8x256xf32>
    %56 = vector.shape_cast %55 : vector<16x8x256xf32> to vector<128x256xf32>
    %57 = arith.truncf %56 : vector<128x256xf32> to vector<128x256xbf16>
    %c0_44 = arith.constant 0 : index
    %c0_45 = arith.constant 0 : index
    %c0_46 = arith.constant 0 : index
    %58 = vector.load %arg4[%c0_44, %c0_45, %c0_46] : memref<3x256x128xbf16, #tpu.memory_space<vmem>>, vector<1x256x128xbf16>
    %59 = vector.shape_cast %58 : vector<1x256x128xbf16> to vector<256x128xbf16>
    %cst_47 = arith.constant dense<0.000000e+00> : vector<128x128xf32>
    %60 = tpu.matmul %57, %59, %cst_47 {dimension_numbers = #tpu.dot_dimension_numbers<[1], [0], [0], [1], [0, 0, 1, 1], [], []>} : vector<128x256xbf16>, vector<256x128xbf16>, vector<128x128xf32> -> vector<128x128xf32>
    %c1_48 = arith.constant 1 : index
    %c0_49 = arith.constant 0 : index
    %c0_50 = arith.constant 0 : index
    %61 = vector.load %arg7[%c1_48, %c0_49, %c0_50] : memref<18x9x128xf32, #tpu.memory_space<vmem>>, vector<16x9x128xf32>
    %62 = vector.extract_strided_slice %61 {offsets = [0, 0, 0], sizes = [16, 8, 128], strides = [1, 1, 1]} : vector<16x9x128xf32> to vector<16x8x128xf32>
    %63 = vector.extract_strided_slice %61 {offsets = [0, 1, 0], sizes = [16, 8, 128], strides = [1, 1, 1]} : vector<16x9x128xf32> to vector<16x8x128xf32>
    %64 = tpu.concatenate %62, %63 in 2 : vector<16x8x128xf32>, vector<16x8x128xf32> -> vector<16x8x256xf32>
    %65 = vector.shape_cast %64 : vector<16x8x256xf32> to vector<128x256xf32>
    %66 = arith.truncf %65 : vector<128x256xf32> to vector<128x256xbf16>
    %c1_51 = arith.constant 1 : index
    %c0_52 = arith.constant 0 : index
    %c0_53 = arith.constant 0 : index
    %67 = vector.load %arg4[%c1_51, %c0_52, %c0_53] : memref<3x256x128xbf16, #tpu.memory_space<vmem>>, vector<1x256x128xbf16>
    %68 = vector.shape_cast %67 : vector<1x256x128xbf16> to vector<256x128xbf16>
    %cst_54 = arith.constant dense<0.000000e+00> : vector<128x128xf32>
    %69 = tpu.matmul %66, %68, %cst_54 {dimension_numbers = #tpu.dot_dimension_numbers<[1], [0], [0], [1], [0, 0, 1, 1], [], []>} : vector<128x256xbf16>, vector<256x128xbf16>, vector<128x128xf32> -> vector<128x128xf32>
    %70 = arith.addf %60, %69 : vector<128x128xf32>
    %c2_55 = arith.constant 2 : index
    %c0_56 = arith.constant 0 : index
    %c0_57 = arith.constant 0 : index
    %71 = vector.load %arg7[%c2_55, %c0_56, %c0_57] : memref<18x9x128xf32, #tpu.memory_space<vmem>>, vector<16x9x128xf32>
    %72 = vector.extract_strided_slice %71 {offsets = [0, 0, 0], sizes = [16, 8, 128], strides = [1, 1, 1]} : vector<16x9x128xf32> to vector<16x8x128xf32>
    %73 = vector.extract_strided_slice %71 {offsets = [0, 1, 0], sizes = [16, 8, 128], strides = [1, 1, 1]} : vector<16x9x128xf32> to vector<16x8x128xf32>
    %74 = tpu.concatenate %72, %73 in 2 : vector<16x8x128xf32>, vector<16x8x128xf32> -> vector<16x8x256xf32>
    %75 = vector.shape_cast %74 : vector<16x8x256xf32> to vector<128x256xf32>
    %76 = arith.truncf %75 : vector<128x256xf32> to vector<128x256xbf16>
    %c2_58 = arith.constant 2 : index
    %c0_59 = arith.constant 0 : index
    %c0_60 = arith.constant 0 : index
    %77 = vector.load %arg4[%c2_58, %c0_59, %c0_60] : memref<3x256x128xbf16, #tpu.memory_space<vmem>>, vector<1x256x128xbf16>
    %78 = vector.shape_cast %77 : vector<1x256x128xbf16> to vector<256x128xbf16>
    %cst_61 = arith.constant dense<0.000000e+00> : vector<128x128xf32>
    %79 = tpu.matmul %76, %78, %cst_61 {dimension_numbers = #tpu.dot_dimension_numbers<[1], [0], [0], [1], [0, 0, 1, 1], [], []>} : vector<128x256xbf16>, vector<256x128xbf16>, vector<128x128xf32> -> vector<128x128xf32>
    %80 = arith.addf %70, %79 : vector<128x128xf32>
    %c0_62 = arith.constant 0 : index
    %c0_63 = arith.constant 0 : index
    %81 = vector.load %arg5[%c0_62, %c0_63] : memref<1x128xf32, #tpu.memory_space<vmem>>, vector<1x128xf32>
    %82 = vector.broadcast %81 : vector<1x128xf32> to vector<128x128xf32>
    %83 = arith.addf %80, %82 : vector<128x128xf32>
    %c0_64 = arith.constant 0 : index
    %c1_65 = arith.constant 1 : index
    %c0_66 = arith.constant 0 : index
    %c0_67 = arith.constant 0 : index
    %84 = vector.load %arg1[%c0_64, %c1_65, %c0_66, %c0_67] : memref<1x18x9x128xf32, #tpu.memory_space<vmem>>, vector<1x16x8x128xf32>
    %85 = vector.shape_cast %84 : vector<1x16x8x128xf32> to vector<16x8x128xf32>
    %86 = vector.shape_cast %85 : vector<16x8x128xf32> to vector<128x128xf32>
    %c0_68 = arith.constant 0 : index
    %c1_69 = arith.constant 1 : index
    %c1_70 = arith.constant 1 : index
    %c0_71 = arith.constant 0 : index
    %87 = vector.load %arg1[%c0_68, %c1_69, %c1_70, %c0_71] : memref<1x18x9x128xf32, #tpu.memory_space<vmem>>, vector<1x16x8x128xf32>
    %88 = vector.shape_cast %87 : vector<1x16x8x128xf32> to vector<16x8x128xf32>
    %89 = vector.shape_cast %88 : vector<16x8x128xf32> to vector<128x128xf32>
    %c64_i32 = arith.constant 64 : i32
    %90 = vector.broadcast %c64_i32 : i32 to vector<128x128xi32>
    %91 = arith.cmpi sge, %1, %90 : vector<128x128xi32>
    %92 = arith.select %91, %86, %89 : vector<128x128xi1>, vector<128x128xf32>
    %c64_i32_72 = arith.constant 64 : i32
    %93 = tpu.dynamic_rotate %92 by %c64_i32_72 dim 1 : vector<128x128xf32>, i32 -> vector<128x128xf32>
    %94 = arith.addf %93, %83 : vector<128x128xf32>
    %95 = vector.shape_cast %94 : vector<128x128xf32> to vector<16x8x128xf32>
    %c0_73 = arith.constant 0 : index
    %c0_74 = arith.constant 0 : index
    %c0_75 = arith.constant 0 : index
    %c0_76 = arith.constant 0 : index
    %96 = vector.load %arg6[%c0_73, %c0_74, %c0_75, %c0_76] : memref<1x16x8x128xf32, #tpu.memory_space<vmem>>, vector<1x16x8x128xf32>
    %97 = vector.shape_cast %96 : vector<1x16x8x128xf32> to vector<16x8x128xf32>
    %98 = vector.shape_cast %95 : vector<16x8x128xf32> to vector<1x16x8x128xf32>
    tpu.vector_store %arg6[%c0_73, %c0_74, %c0_75, %c0_76], %98 {strides = array<i32>} : memref<1x16x8x128xf32, #tpu.memory_space<vmem>>, vector<1x16x8x128xf32>,
    return
  }
  func.func @transform_0(%arg0: i32) -> (i32, i32, i32, i32) {
    %c0_i32 = arith.constant 0 : i32
    %c0_i32_0 = arith.constant 0 : i32
    %c0_i32_1 = arith.constant 0 : i32
    %c0_i32_2 = arith.constant 0 : i32
    return %arg0, %c0_i32, %c0_i32_0, %c0_i32_1 : i32, i32, i32, i32
  }
  func.func @transform_1(%arg0: i32) -> (i32, i32, i32) {
    %c0_i32 = arith.constant 0 : i32
    %c0_i32_0 = arith.constant 0 : i32
    %c0_i32_1 = arith.constant 0 : i32
    %c0_i32_2 = arith.constant 0 : i32
    return %c0_i32, %c0_i32_0, %c0_i32_1 : i32, i32, i32
  }
  func.func @transform_2(%arg0: i32) -> (i32, i32) {
    %c0_i32 = arith.constant 0 : i32
    %c0_i32_0 = arith.constant 0 : i32
    %c0_i32_1 = arith.constant 0 : i32
    return %c0_i32, %c0_i32_0 : i32, i32
  }
  func.func @transform_3(%arg0: i32) -> (i32, i32, i32) {
    %c0_i32 = arith.constant 0 : i32
    %c0_i32_0 = arith.constant 0 : i32
    %c0_i32_1 = arith.constant 0 : i32
    %c0_i32_2 = arith.constant 0 : i32
    return %c0_i32, %c0_i32_0, %c0_i32_1 : i32, i32, i32
  }
  func.func @transform_4(%arg0: i32) -> (i32, i32) {
    %c0_i32 = arith.constant 0 : i32
    %c0_i32_0 = arith.constant 0 : i32
    %c0_i32_1 = arith.constant 0 : i32
    return %c0_i32, %c0_i32_0 : i32, i32
  }
  func.func @transform_5(%arg0: i32) -> (i32, i32, i32, i32) {
    %c0_i32 = arith.constant 0 : i32
    %c0_i32_0 = arith.constant 0 : i32
    %c0_i32_1 = arith.constant 0 : i32
    %c0_i32_2 = arith.constant 0 : i32
    return %arg0, %c0_i32, %c0_i32_0, %c0_i32_1 : i32, i32, i32, i32
  }
}

</mosaic_0001>

<bundles_post_ra>
// kernel: tpu_custom_call.1
= control target key start
LH: loop header
LB: loop body
LE: loop exit
PB: predicated region body
PF: predicated region fallthrough
CT: control target
= control target key end

     0   :  { %10 = vsyncpa [#allocation4], 0  ;;  %s5030_s0 = inlined_call_operand.vmem [shape: f32[2,18,9,128], index: 0, kind: input, shape index: {}]   ;;  %s5031_s1 = inlined_call_operand.vmem [shape: bf16[3,256,128], index: 1, kind: input, shape index: {}]   ;;  %s5032_s2 = inlined_call_operand.vmem [shape: f32[1,128], index: 2, kind: input, shape index: {}]   ;;  %s5033_s3 = inlined_call_operand.vmem [shape: bf16[3,256,128], index: 3, kind: input, shape index: {}]   ;;  %s5034_s4 = inlined_call_operand.vmem [shape: f32[1,128], index: 4, kind: input, shape index: {}]   ;;  %s5035_s5 = inlined_call_operand.hbm [shape: f32[2,16,8,128], index: 5, kind: output, shape index: {}]  }
   0x1   :  { %12 = vsyncpa [#allocation4 + $0x1], 0  ;;  %s3857_s18 = smov 0   ;;  %s3859_s19 = smov 0  }
   0x2   :  { %s3861_s20 = smov 0   ;;  %s3863_s21 = smov 0  }
   0x3 LB: > { %s3878_s22 = sadd.s32 4294967295, %s3820_s21   ;;  %s2899_s23 = sadd.s32 4294967294, %s3820_s21   ;;  %s3820_s21 = sphi %s3863_s21, %s5041_s21   ;;  %s3816_s20 = sphi %s3861_s20, %s5040_s20   ;;  %s3812_s19 = sphi %s3859_s19, %s5039_s19   ;;  %s3808_s18 = sphi %s3857_s18, %s5038_s18  }
   0x4   : > { %s3882_s24 = sadd.s32 1, %s3820_s21   ;;  %s135_s25 = sadd.s32 1, %s3816_s20 }
   0x5   : > { %s132_s26 = ssub.s32 %s3820_s21, %s3882_s24  ;;  %p145_p0 = scmp.ne.s32.totalorder %s3816_s20, %s3812_s19 }
   0x6   : > { %p133_p1 = scmp.eq.s32.totalorder %s132_s26, 0  ;;  %p146_p2 = scmp.eq.s32.totalorder %s3878_s22, 1 }
   0x7   : > { %p151_p3 = scmp.ne.s32.totalorder %s3812_s19, %s3808_s18  ;;  %p152_p4 = scmp.eq.s32.totalorder %s2899_s23, 1 }
   0x8   : > { %s3893_s27 = scalar_select %p133_p1, %s3816_s20, %s135_s25  }
   0x9   : > { %p3895_p5 = por %p146_p2, %p145_p0  ;;  %p3899_p6 = por %p152_p4, %p151_p3 }
   0xa   : > { %p2902_p7 = scmp.ge.s32.totalorder %s3820_s21, 1  ;;  %p190_p8 = scmp.lt.s32.totalorder %s3820_s21, 3 }
   0xc   : > { %p191_p9 = pnand %p2902_p7, %p190_p8 }
   0xd   : > { %v3661_v0 = vld [vmem:[%s5031_s1 + $0xc0] sm:$0xff] (!%p191_p9)   ;;  %v3665_v4 = vld [vmem:[%s5031_s1 + $0xc8] sm:$0xff] (!%p191_p9)   ;;  %v3669_v8 = vld [vmem:[%s5031_s1 + $0xd0] sm:$0xff] (!%p191_p9)   ;;  %p218_p10 = scmp.lt.s32.totalorder (!%p191_p9), %s3878_s22, 1  ;;  %vm290_vm0 = vcmask (!%p191_p9), 1046528   ;;  %s3823_s16 = smov (!%p191_p9), 64  }
   0xe   : > { %194 = sbr.rel (%p191_p9) target bundleno = 825 (0x339), region = 40  ;;  %v3662_v1 = vld [vmem:[%s5031_s1 + $0x40] sm:$0xff] (!%p191_p9)   ;;  %3233 = vmatprep.subr.bf16.mxu0 (!%p191_p9), %v3661_v0  ;;  %v3666_v5 = vld [vmem:[%s5031_s1 + $0x48] sm:$0xff] (!%p191_p9)   ;;  %v3670_v9 = vld [vmem:[%s5031_s1 + $0x50] sm:$0xff] (!%p191_p9)   ;;  %s3232_s11 = sshll.u32 (!%p191_p9), %s3878_s22, 11 }
   0xf   : > { %v3663_v2 = vld [vmem:[%s5031_s1 + $0x80] sm:$0xff] (!%p191_p9)   ;;  %3297 = vmatprep.subr.bf16.mxu1 (!%p191_p9), %v3662_v1  ;;  %v3667_v6 = vld [vmem:[%s5031_s1 + $0x88] sm:$0xff] (!%p191_p9)   ;;  %v3671_v10 = vld [vmem:[%s5031_s1 + $0x90] sm:$0xff] (!%p191_p9)   ;;  %s4981_s15 = scalar_lea.hbm (!%p191_p9), %s5035_s5, %s3232_s11  ;;  %s3824_s25 = smov (!%p191_p9), [#allocation3]  }
  0x10   : > { %v3664_v3 = vld [vmem:[%s5031_s1] sm:$0xff] (!%p191_p9)   ;;  %3234 = vmatpush3.bf16.msra.mxu0 (!%p191_p9), %v3663_v2  ;;  %v3668_v7 = vld [vmem:[%s5031_s1 + $0x8] sm:$0xff] (!%p191_p9)   ;;  %v3672_v11 = vld [vmem:[%s5031_s1 + $0x10] sm:$0xff] (!%p191_p9)  }
  0x11   : > { %3298 = vmatpush3.bf16.msra.mxu1 (!%p191_p9), %v3664_v3  ;;  %3235 = vmatprep.subr.bf16.mxu0 (!%p191_p9), %v3665_v4  ;;  %v3673_v12 = vld [vmem:[%s5031_s1 + $0xd8] sm:$0xff] (!%p191_p9)   ;;  %v3677_v16 = vld [vmem:[%s5031_s1 + $0xe0] sm:$0xff] (!%p191_p9)   ;;  %v3681_v20 = vld [vmem:[%s5031_s1 + $0xe8] sm:$0xff] (!%p191_p9)  }
  0x12   : > { %3299 = vmatprep.subr.bf16.mxu1 (!%p191_p9), %v3666_v5  ;;  %v3674_v13 = vld [vmem:[%s5031_s1 + $0x58] sm:$0xff] (!%p191_p9)   ;;  %v3678_v17 = vld [vmem:[%s5031_s1 + $0x60] sm:$0xff] (!%p191_p9)   ;;  %v3682_v21 = vld [vmem:[%s5031_s1 + $0x68] sm:$0xff] (!%p191_p9)  }
  0x13   : > { %v3675_v14 = vld [vmem:[%s5031_s1 + $0x98] sm:$0xff] (!%p191_p9)   ;;  %v3679_v18 = vld [vmem:[%s5031_s1 + $0xa0] sm:$0xff] (!%p191_p9)   ;;  %v3683_v22 = vld [vmem:[%s5031_s1 + $0xa8] sm:$0xff] (!%p191_p9)  }
  0x14   : > { %3236 = vmatpush3.bf16.msra.mxu0 (!%p191_p9), %v3667_v6  ;;  %v3676_v15 = vld [vmem:[%s5031_s1 + $0x18] sm:$0xff] (!%p191_p9)   ;;  %v3680_v19 = vld [vmem:[%s5031_s1 + $0x20] sm:$0xff] (!%p191_p9)   ;;  %v3684_v23 = vld [vmem:[%s5031_s1 + $0x28] sm:$0xff] (!%p191_p9)  }
  0x15   : > { %3300 = vmatpush3.bf16.msra.mxu1 %v3668_v7  ;;  %3237 = vmatprep.subr.bf16.mxu0 %v3669_v8  ;;  %s219_s17 = scalar_select %p218_p10, %s3878_s22, 1  ;;  %v3685_v24 = vld [vmem:[%s5031_s1 + $0xf0] sm:$0xff]   ;;  %v3689_v28 = vld [vmem:[%s5031_s1 + $0xf8] sm:$0xff]   ;;  %v3693_v49 = vld [vmem:[%s5031_s1 + $0x140] sm:$0xff]  }
  0x16   : > { %3301 = vmatprep.subr.bf16.mxu1 %v3670_v9  ;;  %v3686_v25 = vld [vmem:[%s5031_s1 + $0x70] sm:$0xff]   ;;  %v3690_v29 = vld [vmem:[%s5031_s1 + $0x78] sm:$0xff]   ;;  %v3694_v54 = vld [vmem:[%s5031_s1 + $0x100] sm:$0xff]  }
  0x17   : > { %s3617_s10 = smul.u32 288, %s219_s17  ;;  %v3687_v26 = vld [vmem:[%s5031_s1 + $0xb0] sm:$0xff]   ;;  %v3691_v30 = vld [vmem:[%s5031_s1 + $0xb8] sm:$0xff]   ;;  %v3695_v62 = vld [vmem:[%s5031_s1 + $0x148] sm:$0xff]   ;;  %s3762_s17 = sshll.u32 %s3824_s25, 4  ;;  %s3763_s17 = int_to_ptr.vmem [resolvable:$false] %s3762_s17 }
  0x18   : > { %3238 = vmatpush3.bf16.msra.mxu0 %v3671_v10  ;;  %v3688_v27 = vld [vmem:[%s5031_s1 + $0x30] sm:$0xff]   ;;  %v3692_v31 = vld [vmem:[%s5031_s1 + $0x38] sm:$0xff]   ;;  %v3696_v7 = vld [vmem:[%s5031_s1 + $0x108] sm:$0xff]   ;;  %s3764_s26 = scalar_lea.vmem %s3763_s17, 4096 }
  0x19   : > { %3302 = vmatpush3.bf16.msra.mxu1 %v3672_v11  ;;  %3239 = vmatprep.subr.bf16.mxu0 %v3673_v12  ;;  %s4000_s30 = scalar_lea.vmem %s5030_s0, %s3617_s10 }
  0x1a   : > { %3303 = vmatprep.subr.bf16.mxu1 %v3674_v13  ;;  %v2905_v32 = vld [vmem:[%s4000_s30 + $0x10] sm:$0xff]  ;;  %v2906_v33 = vld [vmem:[%s4000_s30 + $0x18] sm:$0x1]  ;;  %v4011_v34 = vld [vmem:[%s4000_s30 + $0x20] sm:$0xff] }
  0x1b   : > { %v2908_v35 = vld [vmem:[%s4000_s30 + $0x28] sm:$0x1]  ;;  %v468_v36 = vrot.slane %v2905_v32, 1  ;;  %v469_v37 = vrot.slane %v2906_v33, 1  ;;  %v4015_v38 = vrot.slane %v4011_v34, 1  ;;  %v226_v39 = vld [vmem:[%s4000_s30] sm:$0xff]  ;;  %v532_v48 = vpack.c.bf16 %v4011_v34, %v2905_v32 }
  0x1c   : > { %3240 = vmatpush3.bf16.msra.mxu0 %v3675_v14  ;;  %v472_v40 = vrot.slane %v2908_v35, 1  ;;  %v227_v41 = vld [vmem:[%s4000_s30 + $0x8] sm:$0x1]  ;;  %v229_v42 = vld [vmem:[%s4000_s30 + $0x18] sm:$0x1]  ;;  %v291_v43 = vrot.slane %v226_v39, 1  ;;  %v355_v53 = vpack.c.bf16 %v2905_v32, %v226_v39 }
  0x1d   : > { %3304 = vmatpush3.bf16.msra.mxu1 %v3676_v15  ;;  %3241 = vmatprep.subr.bf16.mxu0 %v3677_v16  ;;  %v470_v44 = vsel %vm290_vm0, %v468_v36, %v469_v37  ;;  %v292_v45 = vrot.slane %v227_v41, 1  ;;  %v295_v46 = vrot.slane %v229_v42, 1  ;;  %v2909_v55 = vld [vmem:[%s4000_s30 + $0x30] sm:$0xff]  ;;  %v2910_v56 = vld [vmem:[%s4000_s30 + $0x38] sm:$0x1]  ;;  %v4035_v58 = vld [vmem:[%s4000_s30 + $0x40] sm:$0xff] }
  0x1e   : > { %3305 = vmatprep.subr.bf16.mxu1 %v3678_v17  ;;  %v473_v47 = vsel %vm290_vm0, %v4015_v38, %v472_v40  ;;  %v2912_v59 = vld [vmem:[%s4000_s30 + $0x48] sm:$0x1]  ;;  %v4038_v60 = vrot.slane %v2909_v55, 1  ;;  %v475_v61 = vrot.slane %v2910_v56, 1  ;;  %v4044_v63 = vrot.slane %v4035_v58, 1  ;;  %v4060_v11 = vld [vmem:[%s4000_s30 + $0x50] sm:$0xff] }
  0x1f   : > { %v533_v50 = vpack.c.bf16 %v473_v47, %v470_v44  ;;  %v293_v51 = vsel %vm290_vm0, %v291_v43, %v292_v45  ;;  %v296_v52 = vsel %vm290_vm0, %v468_v36, %v295_v46  ;;  %v478_v0 = vrot.slane %v2912_v59, 1  ;;  %v231_v1 = vld [vmem:[%s4000_s30 + $0x28] sm:$0x1]  ;;  %v233_v2 = vld [vmem:[%s4000_s30 + $0x38] sm:$0x1]  ;;  %v4064_v13 = vld [vmem:[%s4000_s30 + $0x60] sm:$0xff] }
  0x20   : > { %3242 = vmatpush3.bf16.msra.mxu0 %v3679_v18  ;;  %v356_v57 = vpack.c.bf16 %v296_v52, %v293_v51  ;;  %v476_v3 = vsel %vm290_vm0, %v4038_v60, %v475_v61  ;;  %v298_v4 = vrot.slane %v231_v1, 1  ;;  %v301_v5 = vrot.slane %v233_v2, 1  ;;  %v2914_v12 = vld [vmem:[%s4000_s30 + $0x58] sm:$0x1]  ;;  %v2916_v15 = vld [vmem:[%s4000_s30 + $0x68] sm:$0x1] }
  0x21   : > { %3306 = vmatpush3.bf16.msra.mxu1 %v3680_v19  ;;  %3243 = vmatprep.subr.bf16.mxu0 %v3681_v20  ;;  %v479_v6 = vsel %vm290_vm0, %v4044_v63, %v478_v0  ;;  %v4068_v16 = vrot.slane %v4060_v11, 1  ;;  %v481_v17 = vrot.slane %v2914_v12, 1  ;;  %v4071_v18 = vrot.slane %v4064_v13, 1  ;;  %v3697_v19 = vld [vmem:[%s5031_s1 + $0x150] sm:$0xff]   ;;  %v4098_v35 = vld [vmem:[%s4000_s30 + $0x80] sm:$0xff]  ;;  %v3699_v44 = vld [vmem:[%s5031_s1 + $0x158] sm:$0xff]  }
  0x22   : > { %3307 = vmatprep.subr.bf16.mxu1 %v3682_v21  ;;  %709 = vmatprep.mubr.bf16.mxu0 %v533_v50  ;;  %v535_v8 = vpack.c.bf16 %v479_v6, %v476_v3  ;;  %v299_v9 = vsel %vm290_vm0, %v4015_v38, %v298_v4  ;;  %v302_v10 = vsel %vm290_vm0, %v4038_v60, %v301_v5  ;;  %v484_v21 = vrot.slane %v2916_v15, 1  ;;  %v2920_v36 = vld [vmem:[%s4000_s30 + $0x88] sm:$0x1]  ;;  %v241_v45 = vld [vmem:[%s4000_s30 + $0x78] sm:$0x1]  ;;  %v4121_v51 = vld [vmem:[%s4000_s30 + $0x90] sm:$0xff] }
  0x23   : > { %902 = vmatprep.mubr.bf16.mxu1 %v356_v57  ;;  %v358_v14 = vpack.c.bf16 %v302_v10, %v299_v9  ;;  %v534_v20 = vpack.c.bf16 %v4035_v58, %v2909_v55  ;;  %v4105_v41 = vrot.slane %v4098_v35, 1  ;;  %v490_v42 = vrot.slane %v2920_v36, 1  ;;  %v239_v43 = vld [vmem:[%s4000_s30 + $0x68] sm:$0x1]  ;;  %v3700_v47 = vld [vmem:[%s5031_s1 + $0x118] sm:$0xff]   ;;  %v3701_v6 = vld [vmem:[%s5031_s1 + $0x160] sm:$0xff]  }
  0x24   : > { %3244 = vmatpush3.bf16.msra.mxu0 %v3683_v22  ;;  %v235_v22 = vld [vmem:[%s4000_s30 + $0x48] sm:$0x1]  ;;  %v310_v46 = vrot.slane %v239_v43, 1  ;;  %v313_v50 = vrot.slane %v241_v45, 1  ;;  %v4135_v59 = vrot.slane %v4121_v51, 1  ;;  %v4140_v0 = vpack.c.bf16 %v4060_v11, %v4035_v58  ;;  %v3702_v58 = vld [vmem:[%s5031_s1 + $0x120] sm:$0xff]  }
  0x25   : > { %3308 = vmatpush3.bf16.msra.mxu1 %v3684_v23  ;;  %3245 = vmatprep.subr.bf16.mxu0 %v3685_v24  ;;  %v237_v23 = vld [vmem:[%s4000_s30 + $0x58] sm:$0x1]  ;;  %v3698_v24 = vld [vmem:[%s5031_s1 + $0x110] sm:$0xff]   ;;  %v2924_v57 = vld [vmem:[%s4000_s30 + $0xa8] sm:$0x1] }
  0x26   : > { %3309 = vmatprep.subr.bf16.mxu1 %v3686_v25  ;;  %v4083_v25 = vpack.c.bf16 %v2909_v55, %v4011_v34  ;;  %v2918_v34 = vld [vmem:[%s4000_s30 + $0x78] sm:$0x1]  ;;  %v311_v52 = vsel %vm290_vm0, %v4071_v18, %v310_v46  ;;  %v536_v55 = vpack.c.bf16 %v4064_v13, %v4060_v11  ;;  %v496_v3 = vrot.slane %v2924_v57, 1  ;;  %v4153_v9 = vld [vmem:[%s4000_s30 + $0xb0] sm:$0xff]  ;;  %v3703_v15 = vld [vmem:[%s5031_s1 + $0x168] sm:$0xff]  }
  0x27   : > { %v487_v40 = vrot.slane %v2918_v34, 1  ;;  %v245_v4 = vld [vmem:[%s4000_s30 + $0x98] sm:$0x1]  ;;  %v3706_v36 = vld [vmem:[%s5031_s1 + $0x130] sm:$0xff]   ;;  %v2932_v45 = vld [vmem:[%s4000_s30 + $0xe8] sm:$0x1] }
  0x28   : > { %3246 = vmatpush3.bf16.msra.mxu0 %v3687_v26  ;;  %v482_v26 = vsel %vm290_vm0, %v4068_v16, %v481_v17  ;;  %v2926_v12 = vld [vmem:[%s4000_s30 + $0xb8] sm:$0x1]  ;;  %v2928_v17 = vld [vmem:[%s4000_s30 + $0xc8] sm:$0x1] }
  0x29   : > { %3310 = vmatpush3.bf16.msra.mxu1 %v3688_v27  ;;  %3247 = vmatprep.subr.bf16.mxu0 %v3689_v28  ;;  %v304_v27 = vrot.slane %v235_v22, 1  ;;  %v307_v28 = vrot.slane %v237_v23, 1  ;;  %v247_v22 = vld [vmem:[%s4000_s30 + $0xa8] sm:$0x1]  ;;  %v2930_v43 = vld [vmem:[%s4000_s30 + $0xd8] sm:$0x1] }
  0x2a   : > { %3311 = vmatprep.subr.bf16.mxu1 %v3690_v29  ;;  %v485_v29 = vsel %vm290_vm0, %v4071_v18, %v484_v21  ;;  %v322_v34 = vrot.slane %v247_v22, 1  ;;  %v251_v46 = vld [vmem:[%s4000_s30 + $0xc8] sm:$0x1] }
  0x2b   : > { %v305_v32 = vsel %vm290_vm0, %v4044_v63, %v304_v27  ;;  %v308_v33 = vsel %vm290_vm0, %v4068_v16, %v307_v28  ;;  %v249_v27 = vld [vmem:[%s4000_s30 + $0xb8] sm:$0x1]  ;;  %v4184_v28 = vrot.slane %v4153_v9, 1 }
  0x2c   : > { %3248 = vmatpush3.bf16.msra.mxu0 %v3691_v30  ;;  %v4090_v30 = vld [vmem:[%s4000_s30 + $0x70] sm:$0xff]  ;;  %v360_v39 = vpack.c.bf16 %v308_v33, %v305_v32  ;;  %v502_v32 = vrot.slane %v2928_v17, 1 }
  0x2d   : > { %3312 = vmatpush3.bf16.msra.mxu1 %v3692_v31  ;;  %3361 = vmatprep.subr.bf16.mxu0 %v3693_v49  ;;  %v537_v31 = vpack.c.bf16 %v485_v29, %v482_v26  ;;  %v4102_v37 = vrot.slane %v4090_v30, 1  ;;  %v491_v49 = vsel %vm290_vm0, %v4105_v41, %v490_v42  ;;  %v538_v23 = vpack.c.bf16 %v4098_v35, %v4090_v30  ;;  %v4201_v42 = vld [vmem:[%s4000_s30 + $0xd0] sm:$0xff] }
  0x2e   : > { %v499_v29 = vrot.slane %v2926_v12, 1  ;;  %v4227_v57 = vrot.slane %v4201_v42, 1  ;;  %v3002_v12 = vld [vmem:[%s4000_s30 + $0x28] sm:$0x1] }
  0x2f   : > { %710 = vmatmul.mubr.bf16.vlgmr.msra.gmra.mrb[0].mxu0 %v532_v48  ;;  %v488_v48 = vsel %vm290_vm0, %v4102_v37, %v487_v40  ;;  %v314_v56 = vsel %vm290_vm0, %v4102_v37, %v313_v50  ;;  %v253_v50 = vld [vmem:[%s4000_s30 + $0xd8] sm:$0x1] }
  0x30   : > { %903 = vmatmul.mubr.bf16.vlgmr.msra.gmra.mrb[0].mxu1 %v355_v53  ;;  %3362 = vmatpush3.bf16.msra.mxu0 %v3694_v54  ;;  %v2922_v53 = vld [vmem:[%s4000_s30 + $0x98] sm:$0x1]  ;;  %v4127_v54 = vld [vmem:[%s4000_s30 + $0xa0] sm:$0xff]  ;;  %v539_v1 = vpack.c.bf16 %v491_v49, %v488_v48  ;;  %v362_v5 = vpack.c.bf16 %v314_v56, %v311_v52 }
  0x31   : > { %3363 = vmatprep.subr.bf16.mxu0 %v3695_v62  ;;  %717 = vmatprep.mubr.bf16.mxu0 %v535_v8  ;;  %v493_v61 = vrot.slane %v2922_v53, 1  ;;  %v243_v62 = vld [vmem:[%s4000_s30 + $0x88] sm:$0x1]  ;;  %v4143_v2 = vrot.slane %v4127_v54, 1  ;;  %v319_v8 = vrot.slane %v245_v4, 1  ;;  %v3708_v52 = vld [vmem:[%s5031_s1 + $0x138] sm:$0xff]   ;;  %v540_v53 = vpack.c.bf16 %v4127_v54, %v4121_v51 }
  0x32   : > { %910 = vmatprep.mubr.bf16.mxu1 %v358_v14  ;;  %v4162_v14 = vld [vmem:[%s4000_s30 + $0xc0] sm:$0xff]  ;;  %v328_v4 = vrot.slane %v251_v46, 1 }
  0x33   : > { %v494_v10 = vsel %vm290_vm0, %v4135_v59, %v493_v61  ;;  %v497_v11 = vsel %vm290_vm0, %v4143_v2, %v496_v3  ;;  %v320_v21 = vsel %vm290_vm0, %v4135_v59, %v319_v8  ;;  %v323_v48 = vsel %vm290_vm0, %v4143_v2, %v322_v34  ;;  %v255_v8 = vld [vmem:[%s4000_s30 + $0xe8] sm:$0x1] }
  0x34   : > { %3364 = vmatpush3.bf16.msra.mxu0 %v3696_v7  ;;  %v316_v7 = vrot.slane %v243_v62, 1  ;;  %v541_v26 = vpack.c.bf16 %v497_v11, %v494_v10  ;;  %v505_v61 = vrot.slane %v2930_v43, 1  ;;  %v3006_v34 = vld [vmem:[%s4000_s30 + $0x48] sm:$0x1] }
  0x35   : > { %3365 = vmatprep.subr.bf16.mxu0 %v3697_v19  ;;  %v3704_v19 = vld [vmem:[%s5031_s1 + $0x128] sm:$0xff]  }
  0x36   : > { %v506_v10 = vsel %vm290_vm0, %v4227_v57, %v505_v61 }
  0x37   : > { %718 = vmatmul.mubr.bf16.gmra.mrb[4].mxu0 %v534_v20  ;;  %v317_v20 = vsel %vm290_vm0, %v4105_v41, %v316_v7  ;;  %v2936_v7 = vld [vmem:[%s4000_s30 + $0x108] sm:$0x1] }
  0x38   : > { %911 = vmatmul.mubr.bf16.gmra.mrb[4].mxu1 %v4083_v25  ;;  %725 = vmatprep.mubr.bf16.mxu0 %v537_v31  ;;  %v4187_v31 = vrot.slane %v4162_v14, 1  ;;  %v364_v33 = vpack.c.bf16 %v320_v21, %v317_v20 }
  0x39   : > { %918 = vmatprep.mubr.bf16.mxu1 %v360_v39  ;;  %3366 = vmatpush3.bf16.msra.mxu0 %v3698_v24  ;;  %v4180_v24 = vpack.c.bf16 %v4090_v30, %v4064_v13  ;;  %v325_v13 = vrot.slane %v249_v27, 1  ;;  %v3705_v30 = vld [vmem:[%s5031_s1 + $0x170] sm:$0xff]   ;;  %v500_v39 = vsel %vm290_vm0, %v4184_v28, %v499_v29  ;;  %v542_v29 = vpack.c.bf16 %v4162_v14, %v4153_v9 }
  0x3a   : > { %3367 = vmatprep.subr.bf16.mxu0 %v3699_v44  ;;  %v503_v40 = vsel %vm290_vm0, %v4187_v31, %v502_v32  ;;  %v4205_v44 = vld [vmem:[%s4000_s30 + $0xe0] sm:$0xff]  ;;  %v329_v17 = vsel %vm290_vm0, %v4187_v31, %v328_v4  ;;  %v1033_v32 = vrot.slane %v3002_v12, 1 }
  0x3b   : > { %v326_v49 = vsel %vm290_vm0, %v4184_v28, %v325_v13  ;;  %v543_v56 = vpack.c.bf16 %v503_v40, %v500_v39  ;;  %v4230_v62 = vrot.slane %v4205_v44, 1  ;;  %v3008_v13 = vld [vmem:[%s4000_s30 + $0x58] sm:$0x1]  ;;  %v3010_v39 = vld [vmem:[%s4000_s30 + $0x68] sm:$0x1] }
  0x3c   : > { %v366_v3 = vpack.c.bf16 %v326_v49, %v323_v48  ;;  %v3012_v40 = vld [vmem:[%s4000_s30 + $0x78] sm:$0x1]  ;;  %v1042_v46 = vrot.slane %v3008_v13, 1 }
  0x3d   : > { %3368 = vmatpush3.bf16.msra.mxu0 %v3700_v47  ;;  %v3707_v47 = vld [vmem:[%s5031_s1 + $0x178] sm:$0xff]   ;;  %v1048_v48 = vrot.slane %v3012_v40, 1 }
  0x3e   : > { %3369 = vmatprep.subr.bf16.mxu0 %v3701_v6  ;;  %v2933_v6 = vld [vmem:[%s4000_s30 + $0xf0] sm:$0xff] }
  0x3f   : > { %726 = vmatmul.mubr.bf16.gmra.mrb[8].mxu0 %v536_v55  ;;  %v4224_v55 = vpack.c.bf16 %v4121_v51, %v4098_v35  ;;  %v2934_v35 = vld [vmem:[%s4000_s30 + $0xf8] sm:$0x1]  ;;  %v4235_v51 = vld [vmem:[%s4000_s30 + $0x100] sm:$0xff]  ;;  %v4251_v20 = vrot.slane %v2933_v6, 1 }
  0x40   : > { %919 = vmatmul.mubr.bf16.gmra.mrb[8].mxu1 %v4140_v0  ;;  %733 = vmatprep.mubr.bf16.mxu0 %v539_v1  ;;  %v508_v1 = vrot.slane %v2932_v45, 1  ;;  %v511_v21 = vrot.slane %v2934_v35, 1  ;;  %v513_v22 = vrot.slane %v4235_v51, 1  ;;  %v1039_v45 = vrot.slane %v3006_v34, 1  ;;  %v3031_v34 = vld [vmem:[%s4000_s30 + $0x110] sm:$0xff] }
  0x41   : > { %926 = vmatprep.mubr.bf16.mxu1 %v362_v5  ;;  %3370 = vmatpush3.bf16.msra.mxu0 %v3702_v58  ;;  %v331_v5 = vrot.slane %v253_v50, 1  ;;  %v257_v58 = vld [vmem:[%s4000_s30 + $0xf8] sm:$0x1]  ;;  %v546_v4 = vpack.c.bf16 %v4235_v51, %v2933_v6  ;;  %v1043_v35 = vsel %vm290_vm0, %v4068_v16, %v1042_v46 }
  0x42   : > { %3371 = vmatprep.subr.bf16.mxu0 %v3703_v15  ;;  %v509_v11 = vsel %vm290_vm0, %v4230_v62, %v508_v1  ;;  %v3004_v15 = vld [vmem:[%s4000_s30 + $0x38] sm:$0x1]  ;;  %v337_v27 = vrot.slane %v257_v58, 1  ;;  %v512_v49 = vsel %vm290_vm0, %v4251_v20, %v511_v21  ;;  %v1034_v1 = vsel %vm290_vm0, %v4015_v38, %v1033_v32 }
  0x44   : > { %v338_v50 = vsel %vm290_vm0, %v4251_v20, %v337_v27 }
  0x45   : > { %3372 = vmatpush3.bf16.msra.mxu0 %v3704_v19  ;;  %v332_v19 = vsel %vm290_vm0, %v4227_v57, %v331_v5  ;;  %v1040_v5 = vsel %vm290_vm0, %v4044_v63, %v1039_v45 }
  0x46   : > { %3373 = vmatprep.subr.bf16.mxu0 %v3705_v30  ;;  %v4260_v30 = vpack.c.bf16 %v4153_v9, %v4127_v54  ;;  %v368_v43 = vpack.c.bf16 %v332_v19, %v329_v17  ;;  %v1099_v38 = vpack.c.bf16 %v1043_v35, %v1040_v5  ;;  %v3024_v17 = vld [vmem:[%s4000_s30 + $0xd8] sm:$0x1]  ;;  %v3712_v5 = vld [vmem:[%s5033_s3 + $0x88] sm:$0xff]   ;;  %v3718_v35 = vld [vmem:[%s5033_s3] sm:$0xff]  }
  0x47   : > { %734 = vmatmul.mubr.bf16.gmra.mrb[12].mxu0 %v538_v23  ;;  %v514_v23 = vrot.slane %v2936_v7, 1  ;;  %v3016_v7 = vld [vmem:[%s4000_s30 + $0x98] sm:$0x1]  ;;  %v1066_v21 = vrot.slane %v3024_v17, 1  ;;  %v3724_v17 = vld [vmem:[%s5033_s3 + $0x10] sm:$0xff]  }
  0x48   : > { %927 = vmatmul.mubr.bf16.gmra.mrb[12].mxu1 %v4180_v24  ;;  %741 = vmatprep.mubr.bf16.mxu0 %v541_v26  ;;  %v334_v26 = vrot.slane %v255_v8, 1  ;;  %v1054_v58 = vrot.slane %v3016_v7, 1 }
  0x49   : > { %934 = vmatprep.mubr.bf16.mxu1 %v364_v33  ;;  %3374 = vmatpush3.bf16.msra.mxu0 %v3706_v36  ;;  %v1036_v33 = vrot.slane %v3004_v15, 1  ;;  %v545_v36 = vpack.c.bf16 %v509_v11, %v506_v10  ;;  %v515_v54 = vsel %vm290_vm0, %v513_v22, %v514_v23  ;;  %v3018_v10 = vld [vmem:[%s4000_s30 + $0xa8] sm:$0x1]  ;;  %v3020_v11 = vld [vmem:[%s4000_s30 + $0xb8] sm:$0x1] }
  0x4a   : > { %3375 = vmatprep.subr.bf16.mxu0 %v3707_v47  ;;  %v1045_v47 = vrot.slane %v3010_v39, 1  ;;  %v335_v9 = vsel %vm290_vm0, %v4230_v62, %v334_v26  ;;  %v1057_v12 = vrot.slane %v3018_v10, 1  ;;  %v3026_v23 = vld [vmem:[%s4000_s30 + $0xe8] sm:$0x1]  ;;  %v3028_v26 = vld [vmem:[%s4000_s30 + $0xf8] sm:$0x1] }
  0x4b   : > { %v370_v61 = vpack.c.bf16 %v338_v50, %v335_v9  ;;  %v1069_v27 = vrot.slane %v3026_v23, 1 }
  0x4d   : > { %3376 = vmatpush3.bf16.msra.mxu0 %v3708_v52  ;;  %v544_v52 = vpack.c.bf16 %v4205_v44, %v4201_v42  ;;  %v1070_v32 = vsel %vm290_vm0, %v4230_v62, %v1069_v27 }
  0x4f   : > { %742 = vmatmul.mubr.bf16.gmra.mrb[16].mxu0 %v540_v53  ;;  %v4278_v53 = vpack.c.bf16 %v4201_v42, %v4162_v14  ;;  %v369_v14 = vpack.c.bf16 %v2933_v6, %v4205_v44  ;;  %v1046_v44 = vsel %vm290_vm0, %v4071_v18, %v1045_v47  ;;  %v1049_v6 = vsel %vm290_vm0, %v4102_v37, %v1048_v48 }
  0x50   : > { %935 = vmatmul.mubr.bf16.gmra.mrb[16].mxu1 %v4224_v55  ;;  %749 = vmatprep.mubr.bf16.mxu0 %v543_v56  ;;  %v547_v56 = vpack.c.bf16 %v515_v54, %v512_v49  ;;  %v1101_v8 = vpack.c.bf16 %v1049_v6, %v1046_v44  ;;  %v1060_v37 = vrot.slane %v3020_v11, 1  ;;  %v3713_v44 = vld [vmem:[%s5033_s3 + $0xd0] sm:$0xff]  }
  0x51   : > { %942 = vmatprep.mubr.bf16.mxu1 %v366_v3  ;;  %v1037_v3 = vsel %vm290_vm0, %v4038_v60, %v1036_v33  ;;  %v3014_v60 = vld [vmem:[%s4000_s30 + $0x88] sm:$0x1]  ;;  %v3723_v11 = vld [vmem:[%s5033_s3 + $0x50] sm:$0xff]  }
  0x52   : > { %v1097_v42 = vpack.c.bf16 %v1037_v3, %v1034_v1  ;;  %v1051_v63 = vrot.slane %v3014_v60, 1  ;;  %v1061_v15 = vsel %vm290_vm0, %v4184_v28, %v1060_v37  ;;  %v3030_v33 = vld [vmem:[%s4000_s30 + $0x108] sm:$0x1]  ;;  %v3822_v3 = vmov 0.0   ;;  %v3714_v37 = vld [vmem:[%s5033_s3 + $0x90] sm:$0xff]  }
  0x53   : > { %v3711_v1 = vld [vmem:[%s5033_s3 + $0xc8] sm:$0xff]   ;;  %1426 = vst [vmem:[#allocation2 + $0x10] sm:$0x1] %v3822_v3  ;;  %1442 = vst [vmem:[#allocation2 + $0x18] sm:$0x1] %v3822_v3 }
  0x54   : > { %v1052_v16 = vsel %vm290_vm0, %v4105_v41, %v1051_v63  ;;  %v3022_v41 = vld [vmem:[%s4000_s30 + $0xc8] sm:$0x1]  ;;  %1427 = vst [vmem:[#allocation2 + $0x20] sm:$0x1] %v3822_v3  ;;  %1428 = vst [vmem:[#allocation2 + $0x30] sm:$0x1] %v3822_v3 }
  0x55   : > { %1429 = vst [vmem:[#allocation2 + $0x40] sm:$0x1] %v3822_v3  ;;  %1430 = vst [vmem:[#allocation2 + $0x50] sm:$0x1] %v3822_v3 }
  0x56   : > { %1431 = vst [vmem:[#allocation2 + $0x60] sm:$0x1] %v3822_v3  ;;  %1432 = vst [vmem:[#allocation2 + $0x70] sm:$0x1] %v3822_v3 }
  0x57   : > { %750 = vmatmul.mubr.bf16.gmra.mrb[20].mxu0 %v542_v29  ;;  %v1072_v29 = vrot.slane %v3028_v26, 1  ;;  %1433 = vst [vmem:[#allocation2 + $0x80] sm:$0x1] %v3822_v3  ;;  %1434 = vst [vmem:[#allocation2 + $0x90] sm:$0x1] %v3822_v3  ;;  %v3719_v26 = vld [vmem:[%s5033_s3 + $0xe0] sm:$0xff]  }
  0x58   : > { %943 = vmatmul.mubr.bf16.gmra.mrb[20].mxu1 %v4260_v30  ;;  %757 = vmatprep.mubr.bf16.mxu0 %v545_v36  ;;  %v1075_v36 = vrot.slane %v3030_v33, 1  ;;  %1435 = vst [vmem:[#allocation2 + $0xa0] sm:$0x1] %v3822_v3  ;;  %1436 = vst [vmem:[#allocation2 + $0xb0] sm:$0x1] %v3822_v3 }
  0x59   : > { %950 = vmatprep.mubr.bf16.mxu1 %v368_v43  ;;  %1437 = vst [vmem:[#allocation2 + $0xc0] sm:$0x1] %v3822_v3  ;;  %1438 = vst [vmem:[#allocation2 + $0xd0] sm:$0x1] %v3822_v3 }
  0x5a   : > { %1439 = vst [vmem:[#allocation2 + $0xe0] sm:$0x1] %v3822_v3  ;;  %1440 = vst [vmem:[#allocation2 + $0xf0] sm:$0x1] %v3822_v3 }
  0x5b   : > { %1441 = vst [vmem:[#allocation2 + $0x100] sm:$0x1] %v3822_v3  ;;  %1443 = vst [vmem:[#allocation2 + $0x28] sm:$0x1] %v3822_v3 }
  0x5c   : > { %1444 = vst [vmem:[#allocation2 + $0x38] sm:$0x1] %v3822_v3  ;;  %1445 = vst [vmem:[#allocation2 + $0x48] sm:$0x1] %v3822_v3 }
  0x5d   : > { %1446 = vst [vmem:[#allocation2 + $0x58] sm:$0x1] %v3822_v3  ;;  %1447 = vst [vmem:[#allocation2 + $0x68] sm:$0x1] %v3822_v3 }
  0x5e   : > { %1448 = vst [vmem:[#allocation2 + $0x78] sm:$0x1] %v3822_v3  ;;  %1449 = vst [vmem:[#allocation2 + $0x88] sm:$0x1] %v3822_v3 }
  0x5f   : > { %758 = vmatmul.mubr.bf16.gmra.mrb[24].mxu0 %v544_v52  ;;  %1450 = vst [vmem:[#allocation2 + $0x98] sm:$0x1] %v3822_v3  ;;  %1451 = vst [vmem:[#allocation2 + $0xa8] sm:$0x1] %v3822_v3 }
  0x60   : > { %951 = vmatmul.mubr.bf16.gmra.mrb[24].mxu1 %v4278_v53  ;;  %765 = vmatprep.mubr.bf16.mxu0 %v547_v56  ;;  %1452 = vst [vmem:[#allocation2 + $0xb8] sm:$0x1] %v3822_v3  ;;  %1453 = vst [vmem:[#allocation2 + $0xc8] sm:$0x1] %v3822_v3 }
  0x61   : > { %958 = vmatprep.mubr.bf16.mxu1 %v370_v61  ;;  %v3709_v61 = vld [vmem:[%s5033_s3 + $0xc0] sm:$0xff]   ;;  %1454 = vst [vmem:[#allocation2 + $0xd8] sm:$0x1] %v3822_v3  ;;  %1455 = vst [vmem:[#allocation2 + $0xe8] sm:$0x1] %v3822_v3 }
  0x62   : > { %1456 = vst [vmem:[#allocation2 + $0xf8] sm:$0x1] %v3822_v3  ;;  %1457 = vst [vmem:[#allocation2 + $0x108] sm:$0x1] %v3822_v3  ;;  %3425 = vmatprep.subr.bf16.mxu1 %v3709_v61 }
  0x63   : > { %1556 = vst [vmem:[#allocation2] sm:$0xff] %v3822_v3  ;;  %1557 = vst [vmem:[#allocation2 + $0x8] sm:$0x1] %v3822_v3 }
  0x64   : > { %1560 = vst [vmem:[#allocation2 + $0x118] sm:$0x1] %v3822_v3 }
  0x67   : > { %766 = vmatmul.mubr.bf16.gmra.mrb[28].mxu0 %v546_v4 }
  0x68   : > { %959 = vmatmul.mubr.bf16.gmra.mrb[28].mxu1 %v369_v14  ;;  %1273 = vmatprep.mubr.bf16.mxu0 %v1097_v42 }
  0x6f   : > { %1274 = vmatmul.mubr.bf16.vlgmr.msra.gmra.mrb[32].mxu0 %v4083_v25  ;;  %v1055_v25 = vsel %vm290_vm0, %v4135_v59, %v1054_v58  ;;  %v1063_v59 = vrot.slane %v3022_v41, 1  ;;  %v3722_v58 = vld [vmem:[%s5033_s3 + $0x8] sm:$0xff]   ;;  %v3715_v41 = vld [vmem:[%s5033_s3 + $0xd8] sm:$0xff]  }
  0x70   : > { %1281 = vmatprep.mubr.bf16.mxu0 %v1099_v38  ;;  %v1103_v18 = vpack.c.bf16 %v1055_v25, %v1052_v16  ;;  %v3720_v38 = vld [vmem:[%s5033_s3 + $0x48] sm:$0xff]  }
  0x77   : > { %1282 = vmatmul.mubr.bf16.gmra.mrb[36].mxu0 %v4140_v0  ;;  %v1058_v0 = vsel %vm290_vm0, %v4143_v2, %v1057_v12  ;;  %v1067_v2 = vsel %vm290_vm0, %v4227_v57, %v1066_v21  ;;  %v1077_v57 = vrot.slane %v3031_v34, 1 }
  0x78   : > { %1289 = vmatprep.mubr.bf16.mxu0 %v1101_v8  ;;  %v1105_v19 = vpack.c.bf16 %v1061_v15, %v1058_v0 }
  0x7f   : > { %1290 = vmatmul.mubr.bf16.gmra.mrb[40].mxu0 %v4180_v24  ;;  %v1064_v24 = vsel %vm290_vm0, %v4187_v31, %v1063_v59  ;;  %v3032_v31 = vld [vmem:[%s4000_s30 + $0x118] sm:$0x1] }
  0x80   : > { %1297 = vmatprep.mubr.bf16.mxu0 %v1103_v18  ;;  %v1107_v28 = vpack.c.bf16 %v1067_v2, %v1064_v24  ;;  %v1078_v39 = vrot.slane %v3032_v31, 1  ;;  %v3726_v59 = vld [vmem:[%s5033_s3 + $0x58] sm:$0xff]   ;;  %v3729_v31 = vld [vmem:[%s5033_s3 + $0x60] sm:$0xff]  }
  0x81   : > { %v3716_v24 = vld [vmem:[%s5033_s3 + $0x98] sm:$0xff]  }
  0x82   : > { %v1079_v40 = vsel %vm290_vm0, %v1077_v57, %v1078_v39  ;;  %v3721_v57 = vld [vmem:[%s5033_s3 + $0xa0] sm:$0xff]  }
  0x87   : > { %1298 = vmatmul.mubr.bf16.gmra.mrb[44].mxu0 %v4224_v55  ;;  %v1073_v55 = vsel %vm290_vm0, %v4251_v20, %v1072_v29  ;;  %v1110_v20 = vpack.c.bf16 %v3031_v34, %v4235_v51  ;;  %v3710_v51 = vld [vmem:[%s5033_s3 + $0x80] sm:$0xff]  }
  0x88   : > { %1305 = vmatprep.mubr.bf16.mxu0 %v1105_v19  ;;  %v1109_v13 = vpack.c.bf16 %v1073_v55, %v1070_v32  ;;  %3426 = vmatpush3.bf16.msra.mxu1 %v3710_v51  ;;  %v3728_v32 = vld [vmem:[%s5033_s3 + $0x18] sm:$0xff]  }
  0x89   : > { %3427 = vmatprep.subr.bf16.mxu1 %v3711_v1 }
  0x8c   : > { %3428 = vmatpush3.bf16.msra.mxu1 %v3712_v5 }
  0x8d   : > { %3429 = vmatprep.subr.bf16.mxu1 %v3713_v44 }
  0x8f   : > { %1306 = vmatmul.mubr.bf16.gmra.mrb[48].mxu0 %v4260_v30  ;;  %v1076_v30 = vsel %vm290_vm0, %v513_v22, %v1075_v36 }
  0x90   : > { %1313 = vmatprep.mubr.bf16.mxu0 %v1107_v28  ;;  %v1111_v62 = vpack.c.bf16 %v1079_v40, %v1076_v30  ;;  %3430 = vmatpush3.bf16.msra.mxu1 %v3714_v37  ;;  %v3725_v40 = vld [vmem:[%s5033_s3 + $0xe8] sm:$0xff]  }
  0x91   : > { %3431 = vmatprep.subr.bf16.mxu1 %v3715_v41 }
  0x94   : > { %3432 = vmatpush3.bf16.msra.mxu1 %v3716_v24 }
  0x95   : > { %3433 = vmatprep.subr.bf16.mxu1 %v3719_v26 }
  0x97   : > { %1314 = vmatmul.mubr.bf16.gmra.mrb[52].mxu0 %v4278_v53 }
  0x98   : > { %1321 = vmatprep.mubr.bf16.mxu0 %v1109_v13  ;;  %3434 = vmatpush3.bf16.msra.mxu1 %v3721_v57 }
  0x99   : > { %3435 = vmatprep.subr.bf16.mxu1 %v3725_v40 }
  0x9f   : > { %1322 = vmatmul.mubr.bf16.gmra.mrb[56].mxu0 %v369_v14  ;;  %v3717_v14 = vld [vmem:[%s5033_s3 + $0x40] sm:$0xff]  }
  0xa0   : > { %1329 = vmatprep.mubr.bf16.mxu0 %v1111_v62  ;;  %3489 = vmatprep.subr.bf16.mxu0 %v3717_v14 }
  0xa1   : > { %3490 = vmatpush3.bf16.msra.mxu0 %v3718_v35 }
  0xa2   : > { %3491 = vmatprep.subr.bf16.mxu0 %v3720_v38 }
  0xa5   : > { %3492 = vmatpush3.bf16.msra.mxu0 %v3722_v58 }
  0xa6   : > { %3493 = vmatprep.subr.bf16.mxu0 %v3723_v11 }
  0xa7   : > { %1330 = vmatmul.mubr.bf16.gmra.mrb[60].mxu0 %v1110_v20 }
  0xa9   : > { %3494 = vmatpush3.bf16.msra.mxu0 %v3724_v17 }
  0xaa   : > { %3495 = vmatprep.subr.bf16.mxu0 %v3726_v59 }
  0xad   : > { %3496 = vmatpush3.bf16.msra.mxu0 %v3728_v32 }
  0xae   : > { %3497 = vmatprep.subr.bf16.mxu0 %v3729_v31 }
 0x102   : > { %v3249_v43 = vpop.f32.mrb[0].mxu0 }
 0x103   : > { %v3313_v45 = vpop.f32.mrb[0].mxu1  ;;  %v3250_v46 = vpop.f32.mrb[1].mxu0 }
 0x104   : > { %v3251_v47 = vadd.f32 %v3250_v46, %v3249_v43  ;;  %v3314_v48 = vpop.f32.mrb[1].mxu1  ;;  %v3252_v49 = vpop.f32.mrb[2].mxu0  ;;  %v3727_v43 = vld [vmem:[%s5033_s3 + $0xa8] sm:$0xff]  }
 0x105   : > { %v3315_v54 = vadd.f32 %v3314_v48, %v3313_v45  ;;  %v3316_v9 = vpop.f32.mrb[2].mxu1  ;;  %v3253_v50 = vpop.f32.mrb[3].mxu0  ;;  %3436 = vmatpush3.bf16.msra.mxu1 %v3727_v43 }
 0x106   : > { %v3254_v52 = vadd.f32 %v3253_v50, %v3252_v49  ;;  %v3317_v53 = vpop.f32.mrb[3].mxu1 }
 0x107   : > { %v4333_v22 = vadd.f32 %v3315_v54, %v3251_v47  ;;  %v3318_v56 = vadd.f32 %v3317_v53, %v3316_v9 }
 0x109   : > { %v4379_v4 = vadd.f32 %v3318_v56, %v3254_v52 }
 0x10a   : > { %v3255_v42 = vpop.f32.mrb[4].mxu0 }
 0x10b   : > { %v3319_v60 = vpop.f32.mrb[4].mxu1  ;;  %v3256_v7 = vpop.f32.mrb[5].mxu0 }
 0x10c   : > { %v3257_v6 = vadd.f32 %v3256_v7, %v3255_v42  ;;  %v3320_v8 = vpop.f32.mrb[5].mxu1  ;;  %v3258_v63 = vpop.f32.mrb[6].mxu0 }
 0x10d   : > { %v3321_v16 = vadd.f32 %v3320_v8, %v3319_v60  ;;  %v3322_v25 = vpop.f32.mrb[6].mxu1  ;;  %v3259_v10 = vpop.f32.mrb[7].mxu0 }
 0x10e   : > { %v3260_v18 = vadd.f32 %v3259_v10, %v3258_v63  ;;  %v3323_v12 = vpop.f32.mrb[7].mxu1 }
 0x10f   : > { %v4405_v0 = vadd.f32 %v3321_v16, %v3257_v6  ;;  %v3324_v15 = vadd.f32 %v3323_v12, %v3322_v25 }
 0x111   : > { %v4413_v19 = vadd.f32 %v3324_v15, %v3260_v18 }
 0x112   : > { %v3261_v21 = vpop.f32.mrb[8].mxu0 }
 0x113   : > { %v3325_v2 = vpop.f32.mrb[8].mxu1  ;;  %v3262_v23 = vpop.f32.mrb[9].mxu0 }
 0x114   : > { %v3263_v28 = vadd.f32 %v3262_v23, %v3261_v21  ;;  %v3326_v27 = vpop.f32.mrb[9].mxu1  ;;  %v3264_v29 = vpop.f32.mrb[10].mxu0 }
 0x115   : > { %v3327_v55 = vadd.f32 %v3326_v27, %v3325_v2  ;;  %v3328_v33 = vpop.f32.mrb[10].mxu1  ;;  %v3265_v34 = vpop.f32.mrb[11].mxu0 }
 0x116   : > { %v3266_v13 = vadd.f32 %v3265_v34, %v3264_v29  ;;  %v3329_v36 = vpop.f32.mrb[11].mxu1 }
 0x117   : > { %v4433_v39 = vadd.f32 %v3327_v55, %v3263_v28  ;;  %v3330_v30 = vadd.f32 %v3329_v36, %v3328_v33 }
 0x119   : > { %v4438_v62 = vadd.f32 %v3330_v30, %v3266_v13 }
 0x11a   : > { %v3267_v20 = vpop.f32.mrb[12].mxu0 }
 0x11b   : > { %v3331_v45 = vpop.f32.mrb[12].mxu1  ;;  %v3268_v46 = vpop.f32.mrb[13].mxu0 }
 0x11c   : > { %v3269_v47 = vadd.f32 %v3268_v46, %v3267_v20  ;;  %v3332_v48 = vpop.f32.mrb[13].mxu1  ;;  %v3270_v49 = vpop.f32.mrb[14].mxu0 }
 0x11d   : > { %v3333_v54 = vadd.f32 %v3332_v48, %v3331_v45  ;;  %v3334_v9 = vpop.f32.mrb[14].mxu1  ;;  %v3271_v50 = vpop.f32.mrb[15].mxu0 }
 0x11e   : > { %v3272_v52 = vadd.f32 %v3271_v50, %v3270_v49  ;;  %v3335_v53 = vpop.f32.mrb[15].mxu1 }
 0x11f   : > { %v4443_v56 = vadd.f32 %v3333_v54, %v3269_v47  ;;  %v3336_v61 = vadd.f32 %v3335_v53, %v3334_v9 }
 0x121   : > { %v4445_v51 = vadd.f32 %v3336_v61, %v3272_v52 }
 0x122   : > { %v3273_v1 = vpop.f32.mrb[16].mxu0 }
 0x123   : > { %v3337_v14 = vpop.f32.mrb[16].mxu1  ;;  %v3274_v42 = vpop.f32.mrb[17].mxu0 }
 0x124   : > { %v3275_v5 = vadd.f32 %v3274_v42, %v3273_v1  ;;  %v3338_v35 = vpop.f32.mrb[17].mxu1  ;;  %v3276_v38 = vpop.f32.mrb[18].mxu0  ;;  %v3730_v1 = vld [vmem:[%s5033_s3 + $0x20] sm:$0xff]   ;;  %v3731_v42 = vld [vmem:[%s5033_s3 + $0xf0] sm:$0xff]  }
 0x125   : > { %v3339_v60 = vadd.f32 %v3338_v35, %v3337_v14  ;;  %v3340_v7 = vpop.f32.mrb[18].mxu1  ;;  %v3277_v44 = vpop.f32.mrb[19].mxu0  ;;  %3498 = vmatpush3.bf16.msra.mxu0 %v3730_v1  ;;  %3437 = vmatprep.subr.bf16.mxu1 %v3731_v42 }
 0x126   : > { %v3278_v6 = vadd.f32 %v3277_v44, %v3276_v38  ;;  %v3341_v8 = vpop.f32.mrb[19].mxu1 }
 0x127   : > { %v4447_v63 = vadd.f32 %v3339_v60, %v3275_v5  ;;  %v3342_v58 = vadd.f32 %v3341_v8, %v3340_v7  ;;  %v3732_v5 = vld [vmem:[%s5033_s3 + $0x68] sm:$0xff]  }
 0x128   : > { %3499 = vmatprep.subr.bf16.mxu0 %v3732_v5  ;;  %v3734_v60 = vld [vmem:[%s5033_s3 + $0x28] sm:$0xff]  }
 0x129   : > { %v4449_v16 = vadd.f32 %v3342_v58, %v3278_v6  ;;  %v4478_v6 = vld [vmem:[%s5032_s2] ss:$0 sm:$0xff]  ;;  %v3733_v58 = vld [vmem:[%s5033_s3 + $0xb0] sm:$0xff]   ;;  %3500 = vmatpush3.bf16.msra.mxu0 %v3734_v60 }
 0x12a   : > { %v3279_v25 = vpop.f32.mrb[20].mxu0  ;;  %3438 = vmatpush3.bf16.msra.mxu1 %v3733_v58 }
 0x12b   : > { %v3343_v10 = vpop.f32.mrb[20].mxu1  ;;  %v3280_v11 = vpop.f32.mrb[21].mxu0 }
 0x12c   : > { %v3281_v18 = vadd.f32 %v3280_v11, %v3279_v25  ;;  %v3344_v12 = vpop.f32.mrb[21].mxu1  ;;  %v3282_v37 = vpop.f32.mrb[22].mxu0  ;;  %v3735_v25 = vld [vmem:[%s5033_s3 + $0x70] sm:$0xff]  }
 0x12d   : > { %v3345_v15 = vadd.f32 %v3344_v12, %v3343_v10  ;;  %v3346_v41 = vpop.f32.mrb[22].mxu1  ;;  %v3283_v17 = vpop.f32.mrb[23].mxu0  ;;  %3501 = vmatprep.subr.bf16.mxu0 %v3735_v25 }
 0x12e   : > { %v3284_v59 = vadd.f32 %v3283_v17, %v3282_v37  ;;  %v3347_v21 = vpop.f32.mrb[23].mxu1 }
 0x12f   : > { %v4451_v24 = vadd.f32 %v3345_v15, %v3281_v18  ;;  %v3348_v2 = vadd.f32 %v3347_v21, %v3346_v41  ;;  %v3736_v18 = vld [vmem:[%s5033_s3 + $0x30] sm:$0xff]   ;;  %v3737_v15 = vld [vmem:[%s5033_s3 + $0xf8] sm:$0xff]  }
 0x130   : > { %3502 = vmatpush3.bf16.msra.mxu0 %v3736_v18  ;;  %3439 = vmatprep.subr.bf16.mxu1 %v3737_v15 }
 0x131   : > { %v4453_v23 = vadd.f32 %v3348_v2, %v3284_v59 }
 0x132   : > { %v3285_v26 = vpop.f32.mrb[24].mxu0 }
 0x133   : > { %v3349_v28 = vpop.f32.mrb[24].mxu1  ;;  %v3286_v27 = vpop.f32.mrb[25].mxu0 }
 0x134   : > { %v3287_v29 = vadd.f32 %v3286_v27, %v3285_v26  ;;  %v3350_v32 = vpop.f32.mrb[25].mxu1  ;;  %v3288_v55 = vpop.f32.mrb[26].mxu0 }
 0x135   : > { %v3351_v33 = vadd.f32 %v3350_v32, %v3349_v28  ;;  %v3352_v34 = vpop.f32.mrb[26].mxu1  ;;  %v3289_v31 = vpop.f32.mrb[27].mxu0  ;;  %v3739_v32 = vld [vmem:[%s5033_s3 + $0xb8] sm:$0xff]  }
 0x136   : > { %v3290_v13 = vadd.f32 %v3289_v31, %v3288_v55  ;;  %v3353_v36 = vpop.f32.mrb[27].mxu1  ;;  %3440 = vmatpush3.bf16.msra.mxu1 %v3739_v32 }
 0x137   : > { %v4455_v57 = vadd.f32 %v3351_v33, %v3287_v29  ;;  %v3354_v30 = vadd.f32 %v3353_v36, %v3352_v34 }
 0x139   : > { %v4457_v40 = vadd.f32 %v3354_v30, %v3290_v13 }
 0x13a   : > { %v3291_v20 = vpop.f32.mrb[28].mxu0 }
 0x13b   : > { %v3355_v43 = vpop.f32.mrb[28].mxu1  ;;  %v3292_v45 = vpop.f32.mrb[29].mxu0 }
 0x13c   : > { %v3293_v46 = vadd.f32 %v3292_v45, %v3291_v20  ;;  %v3356_v47 = vpop.f32.mrb[29].mxu1  ;;  %v3294_v48 = vpop.f32.mrb[30].mxu0  ;;  %v3741_v45 = vld [vmem:[%s5033_s3 + $0x140] sm:$0xff]  }
 0x13d   : > { %v3357_v49 = vadd.f32 %v3356_v47, %v3355_v43  ;;  %v3358_v54 = vpop.f32.mrb[30].mxu1  ;;  %v3295_v9 = vpop.f32.mrb[31].mxu0  ;;  %3553 = vmatprep.subr.bf16.mxu1 %v3741_v45 }
 0x13e   : > { %v3296_v50 = vadd.f32 %v3295_v9, %v3294_v48  ;;  %v3359_v52 = vpop.f32.mrb[31].mxu1 }
 0x13f   : > { %v4459_v53 = vadd.f32 %v3357_v49, %v3293_v46  ;;  %v3360_v61 = vadd.f32 %v3359_v52, %v3358_v54 }
 0x141   : > { %v4464_v14 = vadd.f32 %v3360_v61, %v3296_v50 }
 0x142   : > { %v3377_v35 = vpop.f32.mrb[32].mxu0 }
 0x143   : > { %v3378_v38 = vpop.f32.mrb[33].mxu0 }
 0x144   : > { %v3379_v7 = vadd.f32 %v3378_v38, %v3377_v35  ;;  %v3380_v44 = vpop.f32.mrb[34].mxu0 }
 0x145   : > { %v3381_v8 = vpop.f32.mrb[35].mxu0 }
 0x146   : > { %v1338_v10 = vadd.f32 %v3379_v7, %v4333_v22  ;;  %v3382_v11 = vadd.f32 %v3381_v8, %v3380_v44  ;;  %v3738_v22 = vld [vmem:[%s5033_s3 + $0x78] sm:$0xff]  }
 0x147   : > { %3503 = vmatprep.subr.bf16.mxu0 %v3738_v22 }
 0x148   : > { %v1361_v12 = vadd.f32 %v4478_v6, %v1338_v10  ;;  %v1339_v37 = vadd.f32 %v3382_v11, %v4379_v4  ;;  %v3740_v4 = vld [vmem:[%s5033_s3 + $0x38] sm:$0xff]  }
 0x149   : > { %3504 = vmatpush3.bf16.msra.mxu0 %v3740_v4 }
 0x14a   : > { %v1362_v41 = vadd.f32 %v4478_v6, %v1339_v37  ;;  %v3383_v17 = vpop.f32.mrb[36].mxu0  ;;  %vm1377_vm1 = vcmp.ge.f32.partialorder %v1361_v12, 0.0  ;;  %v1393_v59 = vmul.f32 0.1, %v1361_v12 }
 0x14b   : > { %v3384_v21 = vpop.f32.mrb[37].mxu0 }
 0x14c   : > { %v3385_v2 = vadd.f32 %v3384_v21, %v3383_v17  ;;  %v3386_v26 = vpop.f32.mrb[38].mxu0  ;;  %v1409_v28 = vsel %vm1377_vm1, %v1361_v12, %v1393_v59  ;;  %v1394_v27 = vmul.f32 0.1, %v1362_v41  ;;  %vm1378_vm2 = vcmp.ge.f32.partialorder %v1362_v41, 0.0 }
 0x14d   : > { %v3387_v29 = vpop.f32.mrb[39].mxu0  ;;  %1474 = vrot.lane.b32.xlu0 %v1409_v28, %s3823_s16 }
 0x14e   : > { %v1340_v55 = vadd.f32 %v3385_v2, %v4405_v0  ;;  %v3388_v33 = vadd.f32 %v3387_v29, %v3386_v26  ;;  %v1410_v13 = vsel %vm1378_vm2, %v1362_v41, %v1394_v27  ;;  %vm1522_vm2 = vcmask 523264  }
 0x150   : > { %v1363_v34 = vadd.f32 %v4478_v6, %v1340_v55  ;;  %v1341_v31 = vadd.f32 %v3388_v33, %v4413_v19 }
 0x151   : > { %1476 = vrot.lane.b32.xlu0 %v1410_v13, %s3823_s16 }
 0x152   : > { %v1364_v36 = vadd.f32 %v4478_v6, %v1341_v31  ;;  %v3389_v30 = vpop.f32.mrb[40].mxu0  ;;  %vm1379_vm3 = vcmp.ge.f32.partialorder %v1363_v34, 0.0  ;;  %v1395_v20 = vmul.f32 0.1, %v1363_v34 }
 0x153   : > { %v3390_v43 = vpop.f32.mrb[41].mxu0 }
 0x154   : > { %v3391_v0 = vadd.f32 %v3390_v43, %v3389_v30  ;;  %v3392_v46 = vpop.f32.mrb[42].mxu0  ;;  %v1411_v47 = vsel %vm1379_vm3, %v1363_v34, %v1395_v20  ;;  %v1396_v48 = vmul.f32 0.1, %v1364_v36  ;;  %vm1380_vm4 = vcmp.ge.f32.partialorder %v1364_v36, 0.0 }
 0x155   : > { %v3393_v49 = vpop.f32.mrb[43].mxu0  ;;  %1478 = vrot.lane.b32.xlu1 %v1411_v47, %s3823_s16  ;;  %vm1539_vm3 = vcmask 1048064  }
 0x156   : > { %v1342_v19 = vadd.f32 %v3391_v0, %v4433_v39  ;;  %v3394_v54 = vadd.f32 %v3393_v49, %v3392_v46  ;;  %v1412_v52 = vsel %vm1380_vm4, %v1364_v36, %v1396_v48 }
 0x158   : > { %v1365_v9 = vadd.f32 %v4478_v6, %v1342_v19  ;;  %v1343_v50 = vadd.f32 %v3394_v54, %v4438_v62 }
 0x159   : > { %1480 = vrot.lane.b32.xlu1 %v1412_v52, %s3823_s16 }
 0x15a   : > { %v1366_v61 = vadd.f32 %v4478_v6, %v1343_v50  ;;  %v3395_v1 = vpop.f32.mrb[44].mxu0  ;;  %vm1381_vm5 = vcmp.ge.f32.partialorder %v1365_v9, 0.0  ;;  %v1397_v42 = vmul.f32 0.1, %v1365_v9 }
 0x15b   : > { %v3396_v5 = vpop.f32.mrb[45].mxu0 }
 0x15c   : > { %v3397_v35 = vadd.f32 %v3396_v5, %v3395_v1  ;;  %v3398_v38 = vpop.f32.mrb[46].mxu0  ;;  %v1413_v60 = vsel %vm1381_vm5, %v1365_v9, %v1397_v42  ;;  %vm1382_vm6 = vcmp.ge.f32.partialorder %v1366_v61, 0.0  ;;  %v1398_v7 = vmul.f32 0.1, %v1366_v61 }
 0x15d   : > { %v3399_v39 = vpop.f32.mrb[47].mxu0  ;;  %1482 = vrot.lane.b32.xlu0 %v1413_v60, %s3823_s16 }
 0x15e   : > { %v1344_v44 = vadd.f32 %v3397_v35, %v4443_v56  ;;  %v3400_v62 = vadd.f32 %v3399_v39, %v3398_v38  ;;  %v1414_v8 = vsel %vm1382_vm6, %v1366_v61, %v1398_v7 }
 0x15f   : > { %1484 = vrot.lane.b32.xlu1 %v1414_v8, %s3823_s16 }
 0x160   : > { %v1367_v58 = vadd.f32 %v4478_v6, %v1344_v44  ;;  %v1345_v25 = vadd.f32 %v3400_v62, %v4445_v51 }
 0x162   : > { %v1368_v10 = vadd.f32 %v4478_v6, %v1345_v25  ;;  %v3401_v11 = vpop.f32.mrb[48].mxu0  ;;  %vm1383_vm7 = vcmp.ge.f32.partialorder %v1367_v58, 0.0  ;;  %v1399_v18 = vmul.f32 0.1, %v1367_v58 }
 0x163   : > { %v3402_v12 = vpop.f32.mrb[49].mxu0 }
 0x164   : > { %v3403_v37 = vadd.f32 %v3402_v12, %v3401_v11  ;;  %v3404_v15 = vpop.f32.mrb[50].mxu0  ;;  %v1415_v22 = vsel %vm1383_vm7, %v1367_v58, %v1399_v18  ;;  %vm1384_vm8 = vcmp.ge.f32.partialorder %v1368_v10, 0.0  ;;  %v1400_v41 = vmul.f32 0.1, %v1368_v10 }
 0x165   : > { %v3405_v56 = vpop.f32.mrb[51].mxu0  ;;  %1486 = vrot.lane.b32.xlu0 %v1415_v22, %s3823_s16 }
 0x166   : > { %v1346_v17 = vadd.f32 %v3403_v37, %v4447_v63  ;;  %v3406_v59 = vadd.f32 %v3405_v56, %v3404_v15  ;;  %v1416_v21 = vsel %vm1384_vm8, %v1368_v10, %v1400_v41 }
 0x167   : > { %1488 = vrot.lane.b32.xlu1 %v1416_v21, %s3823_s16 }
 0x168   : > { %v1369_v51 = vadd.f32 %v4478_v6, %v1346_v17  ;;  %v1347_v4 = vadd.f32 %v3406_v59, %v4449_v16 }
 0x16a   : > { %v1370_v2 = vadd.f32 %v4478_v6, %v1347_v4  ;;  %v3407_v26 = vpop.f32.mrb[52].mxu0  ;;  %vm1385_vm9 = vcmp.ge.f32.partialorder %v1369_v51, 0.0  ;;  %v1401_v28 = vmul.f32 0.1, %v1369_v51 }
 0x16b   : > { %v3408_v27 = vpop.f32.mrb[53].mxu0 }
 0x16c   : > { %v3409_v29 = vadd.f32 %v3408_v27, %v3407_v26  ;;  %v3410_v32 = vpop.f32.mrb[54].mxu0  ;;  %v1417_v55 = vsel %vm1385_vm9, %v1369_v51, %v1401_v28  ;;  %vm1386_vm10 = vcmp.ge.f32.partialorder %v1370_v2, 0.0  ;;  %v1402_v33 = vmul.f32 0.1, %v1370_v2 }
 0x16d   : > { %v3411_v63 = vpop.f32.mrb[55].mxu0  ;;  %1490 = vrot.lane.b32.xlu0 %v1417_v55, %s3823_s16 }
 0x16e   : > { %v1348_v34 = vadd.f32 %v3409_v29, %v4451_v24  ;;  %v3412_v31 = vadd.f32 %v3411_v63, %v3410_v32  ;;  %v1418_v13 = vsel %vm1386_vm10, %v1370_v2, %v1402_v33  ;;  %v224_v2 = vlaneseq  ;;  %v3195_v63 = vld [vmem:[%s4000_s30 + $0x10] sm:$0xff] }
 0x16f   : > { %1492 = vrot.lane.b32.xlu1 %v1418_v13, %s3823_s16 }
 0x170   : > { %v1371_v16 = vadd.f32 %v4478_v6, %v1348_v34  ;;  %v1349_v36 = vadd.f32 %v3412_v31, %v4453_v23  ;;  %v4569_v33 = vand.u32 127, %v224_v2  ;;  %v3211_v34 = vld [vmem:[%s4000_s30 + $0x11] sm:$0xff] }
 0x172   : > { %v1372_v30 = vadd.f32 %v4478_v6, %v1349_v36  ;;  %v3413_v20 = vpop.f32.mrb[56].mxu0  ;;  %vm1387_vm11 = vcmp.ge.f32.partialorder %v1371_v16, 0.0  ;;  %v1403_v43 = vmul.f32 0.1, %v1371_v16  ;;  %vm2742_vm4 = vcmp.ge.s32.totalorder %v4569_v33, 64 }
 0x173   : > { %v3414_v45 = vpop.f32.mrb[57].mxu0 }
 0x174   : > { %v3415_v0 = vadd.f32 %v3414_v45, %v3413_v20  ;;  %v3416_v46 = vpop.f32.mrb[58].mxu0  ;;  %v1419_v47 = vsel %vm1387_vm11, %v1371_v16, %v1403_v43  ;;  %vm1388_vm12 = vcmp.ge.f32.partialorder %v1372_v30, 0.0  ;;  %v1404_v48 = vmul.f32 0.1, %v1372_v30  ;;  %v3196_v20 = vld [vmem:[%s4000_s30 + $0x20] sm:$0xff] }
 0x175   : > { %v3417_v24 = vpop.f32.mrb[59].mxu0  ;;  %1494 = vrot.lane.b32.xlu0 %v1419_v47, %s3823_s16  ;;  %v3742_v45 = vld [vmem:[%s5033_s3 + $0x100] sm:$0xff]  }
 0x176   : > { %v1350_v49 = vadd.f32 %v3415_v0, %v4455_v57  ;;  %v3418_v19 = vadd.f32 %v3417_v24, %v3416_v46  ;;  %v1420_v54 = vsel %vm1388_vm12, %v1372_v30, %v1404_v48 }
 0x177   : > { %1496 = vrot.lane.b32.xlu1 %v1420_v54, %s3823_s16  ;;  %v3197_v54 = vld [vmem:[%s4000_s30 + $0x30] sm:$0xff] }
 0x178   : > { %v1373_v23 = vadd.f32 %v4478_v6, %v1350_v49  ;;  %v1351_v9 = vadd.f32 %v3418_v19, %v4457_v40  ;;  %v3743_v19 = vld [vmem:[%s5033_s3 + $0x148] sm:$0xff]  }
 0x17a   : > { %v1374_v50 = vadd.f32 %v4478_v6, %v1351_v9  ;;  %v3419_v52 = vpop.f32.mrb[60].mxu0  ;;  %vm1389_vm13 = vcmp.ge.f32.partialorder %v1373_v23, 0.0  ;;  %v1405_v61 = vmul.f32 0.1, %v1373_v23  ;;  %v2743_v9 = vsel %vm2742_vm4, %v3195_v63, %v3211_v34  ;;  %v3217_v63 = vld [vmem:[%s4000_s30 + $0x71] sm:$0xff] }
 0x17b   : > { %v3420_v1 = vpop.f32.mrb[61].mxu0 }
 0x17c   : > { %v3421_v42 = vadd.f32 %v3420_v1, %v3419_v52  ;;  %v3422_v5 = vpop.f32.mrb[62].mxu0  ;;  %v1421_v35 = vsel %vm1389_vm13, %v1373_v23, %v1405_v61  ;;  %vm1390_vm14 = vcmp.ge.f32.partialorder %v1374_v50, 0.0  ;;  %v1406_v38 = vmul.f32 0.1, %v1374_v50  ;;  %v3213_v23 = vld [vmem:[%s4000_s30 + $0x31] sm:$0xff]  ;;  %v3198_v52 = vld [vmem:[%s4000_s30 + $0x40] sm:$0xff] }
 0x17d   : > { %v3423_v57 = vpop.f32.mrb[63].mxu0  ;;  %1498 = vrot.lane.b32.xlu0 %v1421_v35, %s3823_s16  ;;  %v3214_v61 = vld [vmem:[%s4000_s30 + $0x41] sm:$0xff] }
 0x17e   : > { %v1352_v60 = vadd.f32 %v3421_v42, %v4459_v53  ;;  %v3424_v7 = vadd.f32 %v3423_v57, %v3422_v5  ;;  %v1422_v39 = vsel %vm1390_vm14, %v1374_v50, %v1406_v38 }
 0x17f   : > { %1500 = vrot.lane.b32.xlu1 %v1422_v39, %s3823_s16 }
 0x180   : > { %v1375_v40 = vadd.f32 %v4478_v6, %v1352_v60  ;;  %v1353_v44 = vadd.f32 %v3424_v7, %v4464_v14  ;;  %v1562_v14 = vld [vmem:[#allocation2 + $0x8] sm:$0x1] }
 0x181   : > { %v1626_v18 = vrot.slane %v1562_v14, 1  ;;  %v3744_v7 = vld [vmem:[%s5033_s3 + $0x108] sm:$0xff]  }
 0x182   : > { %v1376_v62 = vadd.f32 %v4478_v6, %v1353_v44  ;;  %vm1391_vm15 = vcmp.ge.f32.partialorder %v1375_v40, 0.0  ;;  %v1407_v8 = vmul.f32 0.1, %v1375_v40  ;;  %v4557_v6 = vrot.slane %v3822_v3, 1  ;;  %v3216_v14 = vld [vmem:[%s4000_s30 + $0x61] sm:$0xff] }
 0x184   : > { %v1423_v58 = vsel %vm1391_vm15, %v1375_v40, %v1407_v8  ;;  %vm1392_vm1 = vcmp.ge.f32.partialorder %v1376_v62, 0.0  ;;  %v1408_v25 = vmul.f32 0.1, %v1376_v62  ;;  %v1627_v56 = vsel %vm290_vm0, %v4557_v6, %v1626_v18  ;;  %v3745_v8 = vld [vmem:[%s5033_s3 + $0x150] sm:$0xff]  }
 0x185   : > { %1502 = vrot.lane.b32.xlu0 %v1423_v58, %s3823_s16  ;;  %v2745_v40 = vsel %vm2742_vm4, %v3197_v54, %v3213_v23  ;;  %v2746_v58 = vsel %vm2742_vm4, %v3198_v52, %v3214_v61  ;;  %v3219_v54 = vld [vmem:[%s4000_s30 + $0x91] sm:$0xff] }
 0x186   : > { %v1424_v10 = vsel %vm1392_vm1, %v1376_v62, %v1408_v25  ;;  %v3199_v25 = vld [vmem:[%s4000_s30 + $0x50] sm:$0xff] }
 0x187   : > { %1504 = vrot.lane.b32.xlu1 %v1424_v10, %s3823_s16  ;;  %v3215_v10 = vld [vmem:[%s4000_s30 + $0x51] sm:$0xff] }
 0x189   : > { %2759 = vrot.lane.b32.xlu0 %v2743_v9, %s3823_s16 }
 0x18d   : > { %2763 = vrot.lane.b32.xlu0 %v2745_v40, %s3823_s16 }
 0x1bf   : > { %v1475_v53 = vpop.permute.xlu0 %1474 }
 0x1c0   : > { %1523 = vst.msk [vmem:[#allocation2 + $0x11] sm:$0xff] %vm1522_vm2, %v1475_v53 }
 0x1c1   : > { %1540 = vst.msk [vmem:[#allocation2 + $0x10] sm:$0xff] %vm1539_vm3, %v1475_v53  ;;  %v3200_v53 = vld [vmem:[%s4000_s30 + $0x60] sm:$0xff] }
 0x1c3   : > { %v1477_v11 = vpop.permute.xlu0 %1476 }
 0x1c4   : > { %1524 = vst.msk [vmem:[#allocation2 + $0x21] sm:$0xff] %vm1522_vm2, %v1477_v11 }
 0x1c5   : > { %1541 = vst.msk [vmem:[#allocation2 + $0x20] sm:$0xff] %vm1539_vm3, %v1477_v11 }
 0x1c7   : > { %v1479_v12 = vpop.permute.xlu1 %1478  ;;  %v1564_v37 = vld [vmem:[#allocation2 + $0x18] sm:$0x1] }
 0x1c8   : > { %1525 = vst.msk [vmem:[#allocation2 + $0x31] sm:$0xff] %vm1522_vm2, %v1479_v12  ;;  %v1563_v15 = vld [vmem:[#allocation2 + $0x10] sm:$0xff]  ;;  %v1629_v22 = vrot.slane %v1564_v37, 1  ;;  %v1738_v41 = vld [vmem:[#allocation2 + $0x18] sm:$0x1] }
 0x1c9   : > { %1542 = vst.msk [vmem:[#allocation2 + $0x30] sm:$0xff] %vm1539_vm3, %v1479_v12  ;;  %v1628_v17 = vrot.slane %v1563_v15, 1  ;;  %v1802_v4 = vrot.slane %v1738_v41, 1  ;;  %v1689_v32 = vpack.c.bf16 %v1563_v15, %v3822_v3  ;;  %v3212_v3 = vld [vmem:[%s4000_s30 + $0x21] sm:$0xff] }
 0x1ca   : > { %v2744_v50 = vsel %vm2742_vm4, %v3196_v20, %v3212_v3  ;;  %v3218_v20 = vld [vmem:[%s4000_s30 + $0x81] sm:$0xff] }
 0x1cb   : > { %v1481_v59 = vpop.permute.xlu1 %1480  ;;  %v1630_v21 = vsel %vm290_vm0, %v1628_v17, %v1629_v22  ;;  %v1740_v51 = vld [vmem:[#allocation2 + $0x28] sm:$0x1]  ;;  %v1803_v13 = vsel %vm290_vm0, %v1628_v17, %v1802_v4  ;;  %2761 = vrot.lane.b32.xlu1 %v2744_v50, %s3823_s16  ;;  %v3204_v50 = vld [vmem:[%s4000_s30 + $0xa0] sm:$0xff] }
 0x1cc   : > { %1526 = vst.msk [vmem:[#allocation2 + $0x41] sm:$0xff] %vm1522_vm2, %v1481_v59  ;;  %v1690_v26 = vpack.c.bf16 %v1630_v21, %v1627_v56  ;;  %v1739_v28 = vld [vmem:[#allocation2 + $0x20] sm:$0xff]  ;;  %v1805_v27 = vrot.slane %v1740_v51, 1  ;;  %v1566_v29 = vld [vmem:[#allocation2 + $0x28] sm:$0x1]  ;;  %v3747_v21 = vld [vmem:[%s5033_s3 + $0x158] sm:$0xff]   ;;  %v2747_v51 = vsel %vm2742_vm4, %v3199_v25, %v3215_v10 }
 0x1cd   : > { %1543 = vst.msk [vmem:[#allocation2 + $0x40] sm:$0xff] %vm1539_vm3, %v1481_v59  ;;  %v4567_v55 = vrot.slane %v1739_v28, 1  ;;  %v1632_v30 = vrot.slane %v1566_v29, 1  ;;  %v1865_v24 = vpack.c.bf16 %v1739_v28, %v1563_v15  ;;  %v3746_v59 = vld [vmem:[%s5033_s3 + $0x110] sm:$0xff]   ;;  %v2748_v29 = vsel %vm2742_vm4, %v3200_v53, %v3216_v14  ;;  %2767 = vrot.lane.b32.xlu0 %v2747_v51, %s3823_s16  ;;  %v3751_v25 = vld [vmem:[%s5033_s3 + $0x168] sm:$0xff]  }
 0x1ce   : > { %2235 = vmatprep.mubr.bf16.mxu0 %v1690_v26 }
 0x1cf   : > { %2236 = vmatmul.mubr.bf16.vlgmr.msra.gmra.mrb[64].mxu0 %v1689_v32  ;;  %v1483_v31 = vpop.permute.xlu0 %1482  ;;  %v1806_v16 = vsel %vm290_vm0, %v4567_v55, %v1805_v27  ;;  %v1568_v36 = vld [vmem:[#allocation2 + $0x38] sm:$0x1]  ;;  %v1633_v1 = vsel %vm290_vm0, %v4567_v55, %v1632_v30  ;;  %2765 = vrot.lane.b32.xlu1 %v2746_v58, %s3823_s16  ;;  %v3201_v32 = vld [vmem:[%s4000_s30 + $0x70] sm:$0xff]  ;;  %v3202_v30 = vld [vmem:[%s4000_s30 + $0x80] sm:$0xff] }
 0x1d0   : > { %1527 = vst.msk [vmem:[#allocation2 + $0x51] sm:$0xff] %vm1522_vm2, %v1483_v31  ;;  %v1866_v43 = vpack.c.bf16 %v1806_v16, %v1803_v13  ;;  %v4582_v0 = vld [vmem:[#allocation2 + $0x30] sm:$0xff]  ;;  %v1635_v46 = vrot.slane %v1568_v36, 1  ;;  %v1742_v47 = vld [vmem:[#allocation2 + $0x38] sm:$0x1]  ;;  %v2750_v9 = vsel %vm2742_vm4, %v3202_v30, %v3218_v20 }
 0x1d1   : > { %1544 = vst.msk [vmem:[#allocation2 + $0x50] sm:$0xff] %vm1539_vm3, %v1483_v31  ;;  %v1485_v48 = vpop.permute.xlu1 %1484  ;;  %v4586_v49 = vrot.slane %v4582_v0, 1  ;;  %v1808_v35 = vrot.slane %v1742_v47, 1  ;;  %v4614_v44 = vpack.c.bf16 %v4582_v0, %v1739_v28  ;;  %v3755_v30 = vld [vmem:[%s5033_s3 + $0x178] sm:$0xff]  }
 0x1d2   : > { %1528 = vst.msk [vmem:[#allocation2 + $0x61] sm:$0xff] %vm1522_vm2, %v1485_v48  ;;  %2042 = vmatprep.mubr.bf16.mxu1 %v1866_v43 }
 0x1d3   : > { %1545 = vst.msk [vmem:[#allocation2 + $0x60] sm:$0xff] %vm1539_vm3, %v1485_v48  ;;  %2043 = vmatmul.mubr.bf16.vlgmr.msra.gmra.mrb[32].mxu1 %v1865_v24  ;;  %v1636_v42 = vsel %vm290_vm0, %v4586_v49, %v1635_v46  ;;  %v1744_v5 = vld [vmem:[#allocation2 + $0x48] sm:$0x1]  ;;  %v1809_v18 = vsel %vm290_vm0, %v4586_v49, %v1808_v35  ;;  %2769 = vrot.lane.b32.xlu1 %v2748_v29, %s3823_s16  ;;  %v3749_v24 = vld [vmem:[%s5033_s3 + $0x160] sm:$0xff]  }
 0x1d4   : > { %3554 = vmatpush3.bf16.msra.mxu1 %v3742_v45  ;;  %v1692_v38 = vpack.c.bf16 %v1636_v42, %v1633_v1  ;;  %v1743_v57 = vld [vmem:[#allocation2 + $0x40] sm:$0xff]  ;;  %v1811_v60 = vrot.slane %v1744_v5, 1  ;;  %v1570_v39 = vld [vmem:[#allocation2 + $0x48] sm:$0x1]  ;;  %v3748_v45 = vld [vmem:[%s5033_s3 + $0x118] sm:$0xff]  }
 0x1d5   : > { %v4616_v62 = vrot.slane %v1743_v57, 1  ;;  %3555 = vmatprep.subr.bf16.mxu1 %v3743_v19  ;;  %v1638_v15 = vrot.slane %v1570_v39, 1  ;;  %v1867_v2 = vpack.c.bf16 %v1743_v57, %v4582_v0  ;;  %v2749_v0 = vsel %vm2742_vm4, %v3201_v32, %v3217_v63  ;;  %v3203_v19 = vld [vmem:[%s4000_s30 + $0x90] sm:$0xff]  ;;  %v3220_v5 = vld [vmem:[%s4000_s30 + $0xa1] sm:$0xff] }
 0x1d6   : > { %2243 = vmatprep.mubr.bf16.mxu0 %v1692_v38  ;;  %2771 = vrot.lane.b32.xlu0 %v2749_v0, %s3823_s16  ;;  %v2752_v14 = vsel %vm2742_vm4, %v3204_v50, %v3220_v5  ;;  %v3754_v32 = vld [vmem:[%s5033_s3 + $0x130] sm:$0xff]  }
 0x1d7   : > { %2244 = vmatmul.mubr.bf16.gmra.mrb[68].mxu0 %v4614_v44  ;;  %v1487_v11 = vpop.permute.xlu0 %1486  ;;  %v1812_v12 = vsel %vm290_vm0, %v4616_v62, %v1811_v60  ;;  %v1572_v37 = vld [vmem:[#allocation2 + $0x58] sm:$0x1]  ;;  %v1639_v13 = vsel %vm290_vm0, %v4616_v62, %v1638_v15  ;;  %v2751_v60 = vsel %vm2742_vm4, %v3203_v19, %v3219_v54  ;;  %2773 = vrot.lane.b32.xlu1 %v2750_v9, %s3823_s16 }
 0x1d8   : > { %v1746_v22 = vld [vmem:[#allocation2 + $0x58] sm:$0x1]  ;;  %1529 = vst.msk [vmem:[#allocation2 + $0x71] sm:$0xff] %vm1522_vm2, %v1487_v11  ;;  %v1868_v41 = vpack.c.bf16 %v1812_v12, %v1809_v18  ;;  %3556 = vmatpush3.bf16.msra.mxu1 %v3744_v7  ;;  %v4634_v56 = vld [vmem:[#allocation2 + $0x50] sm:$0xff]  ;;  %v1641_v17 = vrot.slane %v1572_v37, 1 }
 0x1d9   : > { %1546 = vst.msk [vmem:[#allocation2 + $0x70] sm:$0xff] %vm1539_vm3, %v1487_v11  ;;  %v1489_v4 = vpop.permute.xlu1 %1488  ;;  %v4648_v26 = vrot.slane %v4634_v56, 1  ;;  %v1748_v28 = vld [vmem:[#allocation2 + $0x68] sm:$0x1]  ;;  %v1814_v27 = vrot.slane %v1746_v22, 1  ;;  %3557 = vmatprep.subr.bf16.mxu1 %v3745_v8  ;;  %v4675_v46 = vpack.c.bf16 %v4634_v56, %v1743_v57  ;;  %v3750_v57 = vld [vmem:[%s5033_s3 + $0x120] sm:$0xff]  }
 0x1da   : > { %1530 = vst.msk [vmem:[#allocation2 + $0x81] sm:$0xff] %vm1522_vm2, %v1489_v4  ;;  %2050 = vmatprep.mubr.bf16.mxu1 %v1868_v41  ;;  %v4655_v34 = vld [vmem:[#allocation2 + $0x60] sm:$0xff]  ;;  %v1817_v31 = vrot.slane %v1748_v28, 1  ;;  %v1574_v43 = vld [vmem:[#allocation2 + $0x68] sm:$0x1]  ;;  %2775 = vrot.lane.b32.xlu0 %v2751_v60, %s3823_s16 }
 0x1db   : > { %1547 = vst.msk [vmem:[#allocation2 + $0x80] sm:$0xff] %vm1539_vm3, %v1489_v4  ;;  %2051 = vmatmul.mubr.bf16.gmra.mrb[36].mxu1 %v1867_v2  ;;  %v1642_v16 = vsel %vm290_vm0, %v4648_v26, %v1641_v17  ;;  %v4663_v36 = vrot.slane %v4655_v34, 1  ;;  %v1815_v47 = vsel %vm290_vm0, %v4648_v26, %v1814_v27  ;;  %v1644_v1 = vrot.slane %v1574_v43, 1  ;;  %v3752_v22 = vld [vmem:[%s5033_s3 + $0x128] sm:$0xff]   ;;  %2777 = vrot.lane.b32.xlu1 %v2752_v14, %s3823_s16 }
 0x1dc   : > { %v1694_v3 = vpack.c.bf16 %v1642_v16, %v1639_v13  ;;  %3558 = vmatpush3.bf16.msra.mxu1 %v3746_v59  ;;  %v1869_v39 = vpack.c.bf16 %v4655_v34, %v4634_v56  ;;  %v3753_v59 = vld [vmem:[%s5033_s3 + $0x170] sm:$0xff]  }
 0x1dd   : > { %v1818_v48 = vsel %vm290_vm0, %v4663_v36, %v1817_v31  ;;  %3559 = vmatprep.subr.bf16.mxu1 %v3747_v21  ;;  %v1645_v11 = vsel %vm290_vm0, %v4663_v36, %v1644_v1 }
 0x1de   : > { %2251 = vmatprep.mubr.bf16.mxu0 %v1694_v3  ;;  %v1870_v23 = vpack.c.bf16 %v1818_v48, %v1815_v47 }
 0x1df   : > { %2252 = vmatmul.mubr.bf16.gmra.mrb[72].mxu0 %v4675_v46  ;;  %v1491_v52 = vpop.permute.xlu0 %1490  ;;  %v1576_v61 = vld [vmem:[#allocation2 + $0x78] sm:$0x1] }
 0x1e0   : > { %v1750_v42 = vld [vmem:[#allocation2 + $0x78] sm:$0x1]  ;;  %1531 = vst.msk [vmem:[#allocation2 + $0x91] sm:$0xff] %vm1522_vm2, %v1491_v52  ;;  %2058 = vmatprep.mubr.bf16.mxu1 %v1870_v23  ;;  %v1575_v35 = vld [vmem:[#allocation2 + $0x70] sm:$0xff]  ;;  %v1647_v38 = vrot.slane %v1576_v61, 1  ;;  %3560 = vmatpush3.bf16.msra.mxu1 %v3748_v45 }
 0x1e1   : > { %1548 = vst.msk [vmem:[#allocation2 + $0x90] sm:$0xff] %vm1539_vm3, %v1491_v52  ;;  %v1493_v7 = vpop.permute.xlu1 %1492  ;;  %v4701_v40 = vrot.slane %v1575_v35, 1  ;;  %v1752_v8 = vld [vmem:[#allocation2 + $0x88] sm:$0x1]  ;;  %v1820_v58 = vrot.slane %v1750_v42, 1  ;;  %3561 = vmatprep.subr.bf16.mxu1 %v3749_v24  ;;  %v4722_v41 = vpack.c.bf16 %v1575_v35, %v4655_v34  ;;  %v3756_v24 = vld [vmem:[%s5033_s3 + $0x138] sm:$0xff]  }
 0x1e2   : > { %1532 = vst.msk [vmem:[#allocation2 + $0xa1] sm:$0xff] %vm1522_vm2, %v1493_v7  ;;  %v1751_v10 = vld [vmem:[#allocation2 + $0x80] sm:$0xff]  ;;  %v1823_v53 = vrot.slane %v1752_v8, 1  ;;  %v1578_v15 = vld [vmem:[#allocation2 + $0x88] sm:$0x1] }
 0x1e3   : > { %1549 = vst.msk [vmem:[#allocation2 + $0xa0] sm:$0xff] %vm1539_vm3, %v1493_v7  ;;  %2059 = vmatmul.mubr.bf16.gmra.mrb[40].mxu1 %v1869_v39  ;;  %v1648_v18 = vsel %vm290_vm0, %v4701_v40, %v1647_v38  ;;  %v4715_v12 = vrot.slane %v1751_v10, 1  ;;  %v1821_v56 = vsel %vm290_vm0, %v4701_v40, %v1820_v58  ;;  %v1650_v2 = vrot.slane %v1578_v15, 1 }
 0x1e4   : > { %v1696_v37 = vpack.c.bf16 %v1648_v18, %v1645_v11  ;;  %3562 = vmatpush3.bf16.msra.mxu1 %v3750_v57  ;;  %v1871_v34 = vpack.c.bf16 %v1751_v10, %v1575_v35 }
 0x1e5   : > { %v1824_v17 = vsel %vm290_vm0, %v4715_v12, %v1823_v53  ;;  %3563 = vmatprep.subr.bf16.mxu1 %v3751_v25  ;;  %v1651_v43 = vsel %vm290_vm0, %v4715_v12, %v1650_v2 }
 0x1e6   : > { %2259 = vmatprep.mubr.bf16.mxu0 %v1696_v37  ;;  %v1872_v21 = vpack.c.bf16 %v1824_v17, %v1821_v56 }
 0x1e7   : > { %2260 = vmatmul.mubr.bf16.gmra.mrb[76].mxu0 %v4722_v41  ;;  %v1495_v51 = vpop.permute.xlu0 %1494  ;;  %v1580_v4 = vld [vmem:[#allocation2 + $0x98] sm:$0x1] }
 0x1e8   : > { %v1754_v28 = vld [vmem:[#allocation2 + $0x98] sm:$0x1]  ;;  %1533 = vst.msk [vmem:[#allocation2 + $0xb1] sm:$0xff] %vm1522_vm2, %v1495_v51  ;;  %2066 = vmatprep.mubr.bf16.mxu1 %v1872_v21  ;;  %v1579_v27 = vld [vmem:[#allocation2 + $0x90] sm:$0xff]  ;;  %v1653_v29 = vrot.slane %v1580_v4, 1  ;;  %3564 = vmatpush3.bf16.msra.mxu1 %v3752_v22 }
 0x1e9   : > { %1550 = vst.msk [vmem:[#allocation2 + $0xb0] sm:$0xff] %vm1539_vm3, %v1495_v51  ;;  %v1497_v63 = vpop.permute.xlu1 %1496  ;;  %v4738_v31 = vrot.slane %v1579_v27, 1  ;;  %v1756_v13 = vld [vmem:[#allocation2 + $0xa8] sm:$0x1]  ;;  %v1826_v16 = vrot.slane %v1754_v28, 1  ;;  %3565 = vmatprep.subr.bf16.mxu1 %v3753_v59  ;;  %v4754_v19 = vpack.c.bf16 %v1579_v27, %v1751_v10 }
 0x1ea   : > { %1534 = vst.msk [vmem:[#allocation2 + $0xc1] sm:$0xff] %vm1522_vm2, %v1497_v63  ;;  %v1755_v20 = vld [vmem:[#allocation2 + $0xa0] sm:$0xff]  ;;  %v1829_v3 = vrot.slane %v1756_v13, 1  ;;  %v1582_v48 = vld [vmem:[#allocation2 + $0xa8] sm:$0x1] }
 0x1eb   : > { %1551 = vst.msk [vmem:[#allocation2 + $0xc0] sm:$0xff] %vm1539_vm3, %v1497_v63  ;;  %2067 = vmatmul.mubr.bf16.gmra.mrb[44].mxu1 %v1871_v34  ;;  %v1654_v45 = vsel %vm290_vm0, %v4738_v31, %v1653_v29  ;;  %v4749_v0 = vrot.slane %v1755_v20, 1  ;;  %v1827_v54 = vsel %vm290_vm0, %v4738_v31, %v1826_v16  ;;  %v1656_v61 = vrot.slane %v1582_v48, 1 }
 0x1ec   : > { %v1698_v47 = vpack.c.bf16 %v1654_v45, %v1651_v43  ;;  %3566 = vmatpush3.bf16.msra.mxu1 %v3754_v32  ;;  %v1873_v38 = vpack.c.bf16 %v1755_v20, %v1579_v27 }
 0x1ed   : > { %v1830_v23 = vsel %vm290_vm0, %v4749_v0, %v1829_v3  ;;  %3567 = vmatprep.subr.bf16.mxu1 %v3755_v30  ;;  %v1657_v58 = vsel %vm290_vm0, %v4749_v0, %v1656_v61 }
 0x1ee   : > { %2267 = vmatprep.mubr.bf16.mxu0 %v1698_v47  ;;  %v1874_v9 = vpack.c.bf16 %v1830_v23, %v1827_v54 }
 0x1ef   : > { %2268 = vmatmul.mubr.bf16.gmra.mrb[80].mxu0 %v4754_v19  ;;  %v1499_v50 = vpop.permute.xlu0 %1498  ;;  %v1584_v52 = vld [vmem:[#allocation2 + $0xb8] sm:$0x1] }
 0x1f0   : > { %v1758_v1 = vld [vmem:[#allocation2 + $0xb8] sm:$0x1]  ;;  %1535 = vst.msk [vmem:[#allocation2 + $0xd1] sm:$0xff] %vm1522_vm2, %v1499_v50  ;;  %2074 = vmatprep.mubr.bf16.mxu1 %v1874_v9  ;;  %v1583_v42 = vld [vmem:[#allocation2 + $0xb0] sm:$0xff]  ;;  %v1659_v5 = vrot.slane %v1584_v52, 1  ;;  %3568 = vmatpush3.bf16.msra.mxu1 %v3756_v24 }
 0x1f1   : > { %1552 = vst.msk [vmem:[#allocation2 + $0xd0] sm:$0xff] %vm1539_vm3, %v1499_v50  ;;  %v1501_v35 = vpop.permute.xlu1 %1500  ;;  %v4763_v57 = vrot.slane %v1583_v42, 1  ;;  %v1760_v60 = vld [vmem:[#allocation2 + $0xc8] sm:$0x1]  ;;  %v1832_v7 = vrot.slane %v1758_v1, 1  ;;  %v4773_v11 = vpack.c.bf16 %v1583_v42, %v1755_v20 }
 0x1f2   : > { %1536 = vst.msk [vmem:[#allocation2 + $0xe1] sm:$0xff] %vm1522_vm2, %v1501_v35  ;;  %v1759_v39 = vld [vmem:[#allocation2 + $0xc0] sm:$0xff]  ;;  %v1835_v8 = vrot.slane %v1760_v60, 1  ;;  %v1586_v14 = vld [vmem:[#allocation2 + $0xc8] sm:$0x1] }
 0x1f3   : > { %1553 = vst.msk [vmem:[#allocation2 + $0xe0] sm:$0xff] %vm1539_vm3, %v1501_v35  ;;  %2075 = vmatmul.mubr.bf16.gmra.mrb[48].mxu1 %v1873_v38  ;;  %v1660_v25 = vsel %vm290_vm0, %v4763_v57, %v1659_v5  ;;  %v4771_v10 = vrot.slane %v1759_v39, 1  ;;  %v1833_v18 = vsel %vm290_vm0, %v4763_v57, %v1832_v7  ;;  %v1662_v17 = vrot.slane %v1586_v14, 1  ;;  %v2304_v50 = vld [vmem:[#allocation2 + $0x38] sm:$0x1] }
 0x1f4   : > { %v1700_v53 = vpack.c.bf16 %v1660_v25, %v1657_v58  ;;  %v1875_v2 = vpack.c.bf16 %v1759_v39, %v1583_v42  ;;  %v2302_v38 = vld [vmem:[#allocation2 + $0x28] sm:$0x1] }
 0x1f5   : > { %v1836_v37 = vsel %vm290_vm0, %v4771_v10, %v1835_v8  ;;  %v1663_v34 = vsel %vm290_vm0, %v4771_v10, %v1662_v17  ;;  %v2369_v8 = vrot.slane %v2304_v50, 1 }
 0x1f6   : > { %2275 = vmatprep.mubr.bf16.mxu0 %v1700_v53  ;;  %v1876_v15 = vpack.c.bf16 %v1836_v37, %v1833_v18  ;;  %v2366_v18 = vrot.slane %v2302_v38, 1  ;;  %v3207_v38 = vld [vmem:[%s4000_s30 + $0xd0] sm:$0xff] }
 0x1f7   : > { %2276 = vmatmul.mubr.bf16.gmra.mrb[84].mxu0 %v4773_v11  ;;  %v1503_v22 = vpop.permute.xlu0 %1502  ;;  %v1588_v56 = vld [vmem:[#allocation2 + $0xd8] sm:$0x1] }
 0x1f8   : > { %v1762_v59 = vld [vmem:[#allocation2 + $0xd8] sm:$0x1]  ;;  %1537 = vst.msk [vmem:[#allocation2 + $0xf1] sm:$0xff] %vm1522_vm2, %v1503_v22  ;;  %2082 = vmatprep.mubr.bf16.mxu1 %v1876_v15  ;;  %v1587_v21 = vld [vmem:[#allocation2 + $0xd0] sm:$0xff]  ;;  %v1665_v51 = vrot.slane %v1588_v56, 1  ;;  %v2370_v15 = vsel %vm290_vm0, %v4586_v49, %v2369_v8  ;;  %v2367_v17 = vsel %vm290_vm0, %v4567_v55, %v2366_v18  ;;  %v3208_v8 = vld [vmem:[%s4000_s30 + $0xe0] sm:$0xff] }
 0x1f9   : > { %1554 = vst.msk [vmem:[#allocation2 + $0xf0] sm:$0xff] %vm1539_vm3, %v1503_v22  ;;  %v1505_v4 = vpop.permute.xlu1 %1504  ;;  %v4782_v28 = vrot.slane %v1587_v21, 1  ;;  %v1764_v27 = vld [vmem:[#allocation2 + $0xe8] sm:$0x1]  ;;  %v1838_v29 = vrot.slane %v1762_v59, 1  ;;  %v4792_v3 = vpack.c.bf16 %v1587_v21, %v1759_v39  ;;  %v2430_v59 = vpack.c.bf16 %v2370_v15, %v2367_v17 }
 0x1fa   : > { %1538 = vst.msk [vmem:[#allocation2 + $0x101] sm:$0xff] %vm1522_vm2, %v1505_v4  ;;  %v1763_v32 = vld [vmem:[#allocation2 + $0xe0] sm:$0xff]  ;;  %v1841_v63 = vrot.slane %v1764_v27, 1  ;;  %v1590_v20 = vld [vmem:[#allocation2 + $0xe8] sm:$0x1] }
 0x1fb   : > { %1555 = vst.msk [vmem:[#allocation2 + $0x100] sm:$0xff] %vm1539_vm3, %v1505_v4  ;;  %2083 = vmatmul.mubr.bf16.gmra.mrb[52].mxu1 %v1875_v2  ;;  %v1666_v13 = vsel %vm290_vm0, %v4782_v28, %v1665_v51  ;;  %v4790_v16 = vrot.slane %v1763_v32, 1  ;;  %v1839_v43 = vsel %vm290_vm0, %v4782_v28, %v1838_v29  ;;  %v1668_v24 = vrot.slane %v1590_v20, 1  ;;  %v2308_v22 = vld [vmem:[#allocation2 + $0x58] sm:$0x1] }
 0x1fc   : > { %v1702_v30 = vpack.c.bf16 %v1666_v13, %v1663_v34  ;;  %v1877_v52 = vpack.c.bf16 %v1763_v32, %v1587_v21  ;;  %v2306_v21 = vld [vmem:[#allocation2 + $0x48] sm:$0x1]  ;;  %v2375_v51 = vrot.slane %v2308_v22, 1  ;;  %v2312_v27 = vld [vmem:[#allocation2 + $0x78] sm:$0x1]  ;;  %v3209_v22 = vld [vmem:[%s4000_s30 + $0xf0] sm:$0xff] }
 0x1fd   : > { %v1842_v45 = vsel %vm290_vm0, %v4790_v16, %v1841_v63  ;;  %v1669_v60 = vsel %vm290_vm0, %v4790_v16, %v1668_v24  ;;  %v2372_v4 = vrot.slane %v2306_v21, 1  ;;  %v2381_v63 = vrot.slane %v2312_v27, 1  ;;  %v2316_v13 = vld [vmem:[#allocation2 + $0x98] sm:$0x1]  ;;  %v2314_v20 = vld [vmem:[#allocation2 + $0x88] sm:$0x1] }
 0x1fe   : > { %2283 = vmatprep.mubr.bf16.mxu0 %v1702_v30  ;;  %v1878_v47 = vpack.c.bf16 %v1842_v45, %v1839_v43  ;;  %v2376_v2 = vsel %vm290_vm0, %v4648_v26, %v2375_v51  ;;  %v2320_v45 = vld [vmem:[#allocation2 + $0xb8] sm:$0x1]  ;;  %v3205_v24 = vld [vmem:[%s4000_s30 + $0xb0] sm:$0xff]  ;;  %v3226_v21 = vld [vmem:[%s4000_s30 + $0x101] sm:$0xff] }
 0x1ff   : > { %2284 = vmatmul.mubr.bf16.gmra.mrb[88].mxu0 %v4792_v3  ;;  %v1592_v48 = vld [vmem:[#allocation2 + $0xf8] sm:$0x1]  ;;  %v2373_v49 = vsel %vm290_vm0, %v4616_v62, %v2372_v4  ;;  %v2382_v34 = vsel %vm290_vm0, %v4701_v40, %v2381_v63  ;;  %v2387_v62 = vrot.slane %v2316_v13, 1 }
 0x200   : > { %v1766_v54 = vld [vmem:[#allocation2 + $0xf8] sm:$0x1]  ;;  %2090 = vmatprep.mubr.bf16.mxu1 %v1878_v47  ;;  %v1591_v23 = vld [vmem:[#allocation2 + $0xf0] sm:$0xff]  ;;  %v1671_v9 = vrot.slane %v1592_v48, 1  ;;  %v2432_v29 = vpack.c.bf16 %v2376_v2, %v2373_v49  ;;  %v2318_v48 = vld [vmem:[#allocation2 + $0xa8] sm:$0x1] }
 0x201   : > { %v4799_v61 = vrot.slane %v1591_v23, 1  ;;  %v1768_v1 = vld [vmem:[#allocation2 + $0x108] sm:$0x1]  ;;  %v1844_v42 = vrot.slane %v1766_v54, 1  ;;  %v4808_v25 = vpack.c.bf16 %v1591_v23, %v1763_v32  ;;  %v2388_v43 = vsel %vm290_vm0, %v4738_v31, %v2387_v62  ;;  %v3206_v31 = vld [vmem:[%s4000_s30 + $0xc0] sm:$0xff] }
 0x202   : > { %v4801_v5 = vld [vmem:[#allocation2 + $0x100] sm:$0xff]  ;;  %v1847_v35 = vrot.slane %v1768_v1, 1  ;;  %v2310_v32 = vld [vmem:[#allocation2 + $0x68] sm:$0x1]  ;;  %v2393_v54 = vrot.slane %v2320_v45, 1 }
 0x203   : > { %2091 = vmatmul.mubr.bf16.gmra.mrb[56].mxu1 %v1877_v52  ;;  %v1672_v7 = vsel %vm290_vm0, %v4799_v61, %v1671_v9  ;;  %v1846_v39 = vrot.slane %v4801_v5, 1  ;;  %v1845_v53 = vsel %vm290_vm0, %v4799_v61, %v1844_v42  ;;  %v1879_v56 = vpack.c.bf16 %v4801_v5, %v1591_v23  ;;  %v3222_v23 = vld [vmem:[%s4000_s30 + $0xc1] sm:$0xff]  ;;  %v2324_v50 = vld [vmem:[#allocation2 + $0xd8] sm:$0x1] }
 0x204   : > { %v1704_v58 = vpack.c.bf16 %v1672_v7, %v1669_v60  ;;  %v2378_v55 = vrot.slane %v2310_v32, 1  ;;  %v2754_v9 = vsel %vm2742_vm4, %v3206_v31, %v3222_v23  ;;  %v2322_v42 = vld [vmem:[#allocation2 + $0xc8] sm:$0x1]  ;;  %v3223_v60 = vld [vmem:[%s4000_s30 + $0xd1] sm:$0xff] }
 0x205   : > { %v1848_v14 = vsel %vm290_vm0, %v1846_v39, %v1847_v35  ;;  %2781 = vrot.lane.b32.xlu1 %v2754_v9, %s3823_s16  ;;  %v2399_v35 = vrot.slane %v2324_v50, 1  ;;  %v2755_v7 = vsel %vm2742_vm4, %v3207_v38, %v3223_v60  ;;  %v2332_v4 = vld [vmem:[#allocation2 + $0x118] sm:$0x1] }
 0x206   : > { %2291 = vmatprep.mubr.bf16.mxu0 %v1704_v58  ;;  %v1880_v37 = vpack.c.bf16 %v1848_v14, %v1845_v53  ;;  %v2379_v26 = vsel %vm290_vm0, %v4663_v36, %v2378_v55  ;;  %v3221_v36 = vld [vmem:[%s4000_s30 + $0xb1] sm:$0xff]  ;;  %v3224_v58 = vld [vmem:[%s4000_s30 + $0xe1] sm:$0xff] }
 0x207   : > { %2292 = vmatmul.mubr.bf16.gmra.mrb[92].mxu0 %v4808_v25  ;;  %v2434_v30 = vpack.c.bf16 %v2382_v34, %v2379_v26  ;;  %v2328_v53 = vld [vmem:[#allocation2 + $0xf8] sm:$0x1] }
 0x208   : > { %2098 = vmatprep.mubr.bf16.mxu1 %v1880_v37  ;;  %v2326_v37 = vld [vmem:[#allocation2 + $0xe8] sm:$0x1]  ;;  %v2405_v15 = vrot.slane %v2328_v53, 1 }
 0x209   : > { %v2402_v51 = vrot.slane %v2326_v37, 1 }
 0x20b   : > { %2099 = vmatmul.mubr.bf16.gmra.mrb[60].mxu1 %v1879_v56  ;;  %v3225_v56 = vld [vmem:[%s4000_s30 + $0xf1] sm:$0xff]  ;;  %v2403_v2 = vsel %vm290_vm0, %v4790_v16, %v2402_v51 }
 0x20c   : > { %2606 = vmatprep.mubr.bf16.mxu1 %v2430_v59  ;;  %v2757_v17 = vsel %vm2742_vm4, %v3209_v22, %v3225_v56  ;;  %v3210_v59 = vld [vmem:[%s4000_s30 + $0x100] sm:$0xff]  ;;  %s215_s30 = sand.u32 1, %s3812_s19  }
 0x20d   : > { %s2903_s9 = sshll.u32 %s215_s30, 7  ;;  %s4989_s22 = scalar_lea.sflag [#allocation4], %s215_s30 }
 0x20e   : > { %s4932_s10 = scalar_lea.vmem [#allocation3], %s2903_s9 }
 0x20f   : > { %s2837_s12 = sshll.u32 %s4932_s10, 4  ;;  %s4983_s12 = int_to_ptr.vmem [resolvable:$true] %s2837_s12 }
 0x210   : > { %s3758_s23 = scalar_lea.vmem %s4983_s12, 2048  ;;  %p3765_p0 = scmp.lt.s32.totalorder %s4983_s12, %s3763_s17 }
 0x211   : > { %p3759_p11 = scmp.ne.s32.totalorder %s4983_s12, %s3758_s23  ;;  %p3766_p1 = scmp.lt.s32.totalorder %s3764_s26, %s3758_s23 }
 0x213   : > { %2607 = vmatmul.mubr.bf16.vlgmr.msra.gmra.mrb[64].mxu1 %v4614_v44  ;;  %v2384_v44 = vrot.slane %v2314_v20, 1  ;;  %p3760_p12 = pnand %p3759_p11, %p3895_p5  ;;  %p3767_p2 = por %p3766_p1, %p3765_p0 }
 0x214   : > { %2614 = vmatprep.mubr.bf16.mxu1 %v2432_v29  ;;  %v2411_v29 = vrot.slane %v2332_v4, 1 }
 0x215   : > { %v2385_v40 = vsel %vm290_vm0, %v4715_v12, %v2384_v44  ;;  %v2390_v12 = vrot.slane %v2318_v48, 1  ;;  %p3761_p13 = pneg %p3760_p12 }
 0x216   : > { %v2436_v47 = vpack.c.bf16 %v2388_v43, %v2385_v40  ;;  %v2412_v32 = vsel %vm290_vm0, %v4557_v6, %v2411_v29 }
 0x217   : > { %v2391_v52 = vsel %vm290_vm0, %v4749_v0, %v2390_v12  ;;  %v2756_v0 = vsel %vm2742_vm4, %v3208_v8, %v3224_v58  ;;  %p3768_p3 = pnand %p3767_p2, %p3761_p13 }
 0x218   : > { %2785 = vrot.lane.b32.xlu1 %v2756_v0, %s3823_s16 }
 0x21b   : > { %2615 = vmatmul.mubr.bf16.gmra.mrb[68].mxu1 %v4675_v46  ;;  %v2753_v46 = vsel %vm2742_vm4, %v3205_v24, %v3221_v36 }
 0x21c   : > { %2622 = vmatprep.mubr.bf16.mxu1 %v2434_v30  ;;  %2779 = vrot.lane.b32.xlu0 %v2753_v46, %s3823_s16 }
 0x220   : > { %2783 = vrot.lane.b32.xlu0 %v2755_v7, %s3823_s16 }
 0x223   : > { %2623 = vmatmul.mubr.bf16.gmra.mrb[72].mxu1 %v4722_v41  ;;  %v2394_v41 = vsel %vm290_vm0, %v4763_v57, %v2393_v54  ;;  %v2396_v57 = vrot.slane %v2322_v42, 1 }
 0x224   : > { %2630 = vmatprep.mubr.bf16.mxu1 %v2436_v47  ;;  %v2438_v1 = vpack.c.bf16 %v2394_v41, %v2391_v52  ;;  %2787 = vrot.lane.b32.xlu0 %v2757_v17, %s3823_s16 }
 0x225   : > { %v2397_v14 = vsel %vm290_vm0, %v4771_v10, %v2396_v57  ;;  %v2406_v10 = vsel %vm290_vm0, %v4799_v61, %v2405_v15  ;;  %v3757_v61 = vld [vmem:[#allocation2] sm:$0xff] }
 0x226   : > { %v2442_v27 = vpack.c.bf16 %v2406_v10, %v2403_v2  ;;  %v2443_v16 = vpack.c.bf16 %v3757_v61, %v4801_v5 }
 0x22b   : > { %2631 = vmatmul.mubr.bf16.gmra.mrb[76].mxu1 %v4754_v19  ;;  %v2400_v19 = vsel %vm290_vm0, %v4782_v28, %v2399_v35  ;;  %v2758_v28 = vsel %vm2742_vm4, %v3210_v59, %v3226_v21 }
 0x22c   : > { %2638 = vmatprep.mubr.bf16.mxu1 %v2438_v1  ;;  %v2440_v18 = vpack.c.bf16 %v2400_v19, %v2397_v14  ;;  %2789 = vrot.lane.b32.xlu1 %v2758_v28, %s3823_s16 }
 0x233   : > { %2639 = vmatmul.mubr.bf16.gmra.mrb[80].mxu1 %v4773_v11  ;;  %v2330_v11 = vld [vmem:[#allocation2 + $0x108] sm:$0x1] }
 0x234   : > { %2646 = vmatprep.mubr.bf16.mxu1 %v2440_v18  ;;  %v2408_v49 = vrot.slane %v2330_v11, 1 }
 0x236   : > { %v2409_v33 = vsel %vm290_vm0, %v1846_v39, %v2408_v49 }
 0x237   : > { %v2444_v63 = vpack.c.bf16 %v2412_v32, %v2409_v33 }
 0x23b   : > { %2647 = vmatmul.mubr.bf16.gmra.mrb[84].mxu1 %v4792_v3 }
 0x23c   : > { %2654 = vmatprep.mubr.bf16.mxu1 %v2442_v27 }
 0x243   : > { %2655 = vmatmul.mubr.bf16.gmra.mrb[88].mxu1 %v4808_v25 }
 0x244   : > { %2662 = vmatprep.mubr.bf16.mxu1 %v2444_v63 }
 0x24b   : > { %2663 = vmatmul.mubr.bf16.gmra.mrb[92].mxu1 %v2443_v16 }
 0x2a2   : > { %v3505_v55 = vpop.f32.mrb[64].mxu0 }
 0x2a3   : > { %v3506_v3 = vpop.f32.mrb[65].mxu0 }
 0x2a4   : > { %v3507_v34 = vadd.f32 %v3506_v3, %v3505_v55  ;;  %v3508_v13 = vpop.f32.mrb[66].mxu0 }
 0x2a5   : > { %v3509_v26 = vpop.f32.mrb[67].mxu0 }
 0x2a6   : > { %v3510_v30 = vadd.f32 %v3509_v26, %v3508_v13  ;;  %v3441_v20 = vpop.f32.mrb[32].mxu1 }
 0x2a7   : > { %v3442_v62 = vpop.f32.mrb[33].mxu1 }
 0x2a8   : > { %v3443_v39 = vadd.f32 %v3442_v62, %v3441_v20  ;;  %v3444_v44 = vpop.f32.mrb[34].mxu1 }
 0x2a9   : > { %v3445_v43 = vpop.f32.mrb[35].mxu1 }
 0x2aa   : > { %v4888_v6 = vadd.f32 %v3507_v34, %v3443_v39  ;;  %v3446_v45 = vadd.f32 %v3445_v43, %v3444_v44  ;;  %v3511_v25 = vpop.f32.mrb[68].mxu0 }
 0x2ab   : > { %v3512_v40 = vpop.f32.mrb[69].mxu0 }
 0x2ac   : > { %v4890_v47 = vadd.f32 %v3510_v30, %v3446_v45  ;;  %v3513_v5 = vadd.f32 %v3512_v40, %v3511_v25  ;;  %v3514_v48 = vpop.f32.mrb[70].mxu0 }
 0x2ad   : > { %v3515_v24 = vpop.f32.mrb[71].mxu0 }
 0x2ae   : > { %v3516_v36 = vadd.f32 %v3515_v24, %v3514_v48  ;;  %v3447_v54 = vpop.f32.mrb[36].mxu1 }
 0x2af   : > { %v3448_v46 = vpop.f32.mrb[37].mxu1 }
 0x2b0   : > { %v3449_v31 = vadd.f32 %v3448_v46, %v3447_v54  ;;  %v3450_v23 = vpop.f32.mrb[38].mxu1 }
 0x2b1   : > { %v3451_v12 = vpop.f32.mrb[39].mxu1 }
 0x2b2   : > { %v4892_v9 = vadd.f32 %v3513_v5, %v3449_v31  ;;  %v3452_v41 = vadd.f32 %v3451_v12, %v3450_v23  ;;  %v3517_v50 = vpop.f32.mrb[72].mxu0 }
 0x2b3   : > { %v3518_v52 = vpop.f32.mrb[73].mxu0 }
 0x2b4   : > { %v4894_v1 = vadd.f32 %v3516_v36, %v3452_v41  ;;  %v3519_v42 = vadd.f32 %v3518_v52, %v3517_v50  ;;  %v3520_v35 = vpop.f32.mrb[74].mxu0 }
 0x2b5   : > { %v3521_v38 = vpop.f32.mrb[75].mxu0 }
 0x2b6   : > { %v3522_v60 = vadd.f32 %v3521_v38, %v3520_v35  ;;  %v3453_v7 = vpop.f32.mrb[40].mxu1 }
 0x2b7   : > { %v3454_v8 = vpop.f32.mrb[41].mxu1 }
 0x2b8   : > { %v3455_v58 = vadd.f32 %v3454_v8, %v3453_v7  ;;  %v3456_v57 = vpop.f32.mrb[42].mxu1 }
 0x2b9   : > { %v3457_v0 = vpop.f32.mrb[43].mxu1 }
 0x2ba   : > { %v4896_v19 = vadd.f32 %v3519_v42, %v3455_v58  ;;  %v3458_v53 = vadd.f32 %v3457_v0, %v3456_v57  ;;  %v3523_v14 = vpop.f32.mrb[76].mxu0 }
 0x2bb   : > { %v3524_v18 = vpop.f32.mrb[77].mxu0 }
 0x2bc   : > { %v4898_v37 = vadd.f32 %v3522_v60, %v3458_v53  ;;  %v3525_v15 = vadd.f32 %v3524_v18, %v3523_v14  ;;  %v3526_v22 = vpop.f32.mrb[78].mxu0 }
 0x2bd   : > { %v3527_v56 = vpop.f32.mrb[79].mxu0 }
 0x2be   : > { %v3528_v17 = vadd.f32 %v3527_v56, %v3526_v22  ;;  %v3459_v59 = vpop.f32.mrb[44].mxu1 }
 0x2bf   : > { %v3460_v21 = vpop.f32.mrb[45].mxu1 }
 0x2c0   : > { %v3461_v51 = vadd.f32 %v3460_v21, %v3459_v59  ;;  %v3462_v28 = vpop.f32.mrb[46].mxu1 }
 0x2c1   : > { %v3463_v10 = vpop.f32.mrb[47].mxu1 }
 0x2c2   : > { %v4900_v11 = vadd.f32 %v3525_v15, %v3461_v51  ;;  %v3464_v4 = vadd.f32 %v3463_v10, %v3462_v28  ;;  %v3529_v2 = vpop.f32.mrb[80].mxu0 }
 0x2c3   : > { %v3530_v27 = vpop.f32.mrb[81].mxu0 }
 0x2c4   : > { %v4902_v49 = vadd.f32 %v3528_v17, %v3464_v4  ;;  %v3531_v29 = vadd.f32 %v3530_v27, %v3529_v2  ;;  %v3532_v33 = vpop.f32.mrb[82].mxu0 }
 0x2c5   : > { %v3533_v32 = vpop.f32.mrb[83].mxu0 }
 0x2c6   : > { %v3534_v63 = vadd.f32 %v3533_v32, %v3532_v33  ;;  %v3465_v61 = vpop.f32.mrb[48].mxu1 }
 0x2c7   : > { %v3466_v16 = vpop.f32.mrb[49].mxu1 }
 0x2c8   : > { %v3467_v55 = vadd.f32 %v3466_v16, %v3465_v61  ;;  %v3468_v3 = vpop.f32.mrb[50].mxu1 }
 0x2c9   : > { %v3469_v34 = vpop.f32.mrb[51].mxu1 }
 0x2ca   : > { %v4904_v13 = vadd.f32 %v3531_v29, %v3467_v55  ;;  %v3470_v26 = vadd.f32 %v3469_v34, %v3468_v3  ;;  %v3535_v30 = vpop.f32.mrb[84].mxu0  ;;  %v2760_v55 = vpop.permute.xlu0 %2759 }
 0x2cb   : > { %v3536_v20 = vpop.f32.mrb[85].mxu0 }
 0x2cc   : > { %v4906_v62 = vadd.f32 %v3534_v63, %v3470_v26  ;;  %v3537_v39 = vadd.f32 %v3536_v20, %v3535_v30  ;;  %v3538_v44 = vpop.f32.mrb[86].mxu0  ;;  %v4924_v63 = vld [vmem:[%s5034_s4] ss:$0 sm:$0xff]  ;;  %v2762_v26 = vpop.permute.xlu1 %2761 }
 0x2cd   : > { %v3539_v43 = vpop.f32.mrb[87].mxu0 }
 0x2ce   : > { %v3540_v45 = vadd.f32 %v3539_v43, %v3538_v44  ;;  %v3471_v25 = vpop.f32.mrb[52].mxu1 }
 0x2cf   : > { %v3472_v40 = vpop.f32.mrb[53].mxu1 }
 0x2d0   : > { %v3473_v5 = vadd.f32 %v3472_v40, %v3471_v25  ;;  %v3474_v48 = vpop.f32.mrb[54].mxu1 }
 0x2d1   : > { %v3475_v24 = vpop.f32.mrb[55].mxu1 }
 0x2d2   : > { %v4908_v36 = vadd.f32 %v3537_v39, %v3473_v5  ;;  %v3476_v54 = vadd.f32 %v3475_v24, %v3474_v48  ;;  %v3541_v46 = vpop.f32.mrb[88].mxu0  ;;  %v2764_v5 = vpop.permute.xlu0 %2763 }
 0x2d3   : > { %v3542_v31 = vpop.f32.mrb[89].mxu0 }
 0x2d4   : > { %v4910_v23 = vadd.f32 %v3540_v45, %v3476_v54  ;;  %v3543_v12 = vadd.f32 %v3542_v31, %v3541_v46  ;;  %v3544_v41 = vpop.f32.mrb[90].mxu0  ;;  %v2766_v54 = vpop.permute.xlu1 %2765 }
 0x2d5   : > { %v3545_v50 = vpop.f32.mrb[91].mxu0 }
 0x2d6   : > { %v3546_v52 = vadd.f32 %v3545_v50, %v3544_v41  ;;  %v3477_v42 = vpop.f32.mrb[56].mxu1 }
 0x2d7   : > { %v3478_v35 = vpop.f32.mrb[57].mxu1 }
 0x2d8   : > { %v3479_v38 = vadd.f32 %v3478_v35, %v3477_v42  ;;  %v3480_v60 = vpop.f32.mrb[58].mxu1 }
 0x2d9   : > { %v3481_v7 = vpop.f32.mrb[59].mxu1 }
 0x2da   : > { %v4912_v8 = vadd.f32 %v3543_v12, %v3479_v38  ;;  %v3482_v58 = vadd.f32 %v3481_v7, %v3480_v60  ;;  %v3547_v57 = vpop.f32.mrb[92].mxu0 }
 0x2db   : > { %v3548_v0 = vpop.f32.mrb[93].mxu0 }
 0x2dc   : > { %v4914_v53 = vadd.f32 %v3546_v52, %v3482_v58  ;;  %v3549_v14 = vadd.f32 %v3548_v0, %v3547_v57  ;;  %v3550_v18 = vpop.f32.mrb[94].mxu0  ;;  %v2770_v58 = vpop.permute.xlu1 %2769 }
 0x2dd   : > { %v3551_v15 = vpop.f32.mrb[95].mxu0 }
 0x2de   : > { %v3552_v22 = vadd.f32 %v3551_v15, %v3550_v18  ;;  %v3483_v56 = vpop.f32.mrb[60].mxu1 }
 0x2df   : > { %v3484_v17 = vpop.f32.mrb[61].mxu1 }
 0x2e0   : > { %v3485_v59 = vadd.f32 %v3484_v17, %v3483_v56  ;;  %v3486_v21 = vpop.f32.mrb[62].mxu1 }
 0x2e1   : > { %v3487_v51 = vpop.f32.mrb[63].mxu1 }
 0x2e2   : > { %v4916_v28 = vadd.f32 %v3549_v14, %v3485_v59  ;;  %v3488_v10 = vadd.f32 %v3487_v51, %v3486_v21 }
 0x2e4   : > { %v4918_v4 = vadd.f32 %v3552_v22, %v3488_v10  ;;  %v2774_v10 = vpop.permute.xlu1 %2773 }
 0x2e6   : > { %v3569_v2 = vpop.f32.mrb[64].mxu1 }
 0x2e7   : > { %v3570_v27 = vpop.f32.mrb[65].mxu1 }
 0x2e8   : > { %v3571_v29 = vadd.f32 %v3570_v27, %v3569_v2  ;;  %v3572_v33 = vpop.f32.mrb[66].mxu1 }
 0x2e9   : > { %v3573_v32 = vpop.f32.mrb[67].mxu1 }
 0x2ea   : > { %v2671_v61 = vadd.f32 %v3571_v29, %v4888_v6  ;;  %v3574_v16 = vadd.f32 %v3573_v32, %v3572_v33 }
 0x2ec   : > { %v2672_v3 = vadd.f32 %v3574_v16, %v4890_v47  ;;  %v2694_v34 = vadd.f32 %v4924_v63, %v2671_v61 }
 0x2ee   : > { %v2791_v30 = vadd.f32 %v2760_v55, %v2694_v34  ;;  %v3575_v20 = vpop.f32.mrb[68].mxu1  ;;  %v2695_v39 = vadd.f32 %v4924_v63, %v2672_v3 }
 0x2ef   : > { %v3576_v44 = vpop.f32.mrb[69].mxu1 }
 0x2f0   : > { %2807 = vst [vmem:[%s4932_s10] sm:$0xff] %v2791_v30  ;;  %v2792_v6 = vadd.f32 %v2762_v26, %v2695_v39  ;;  %v3577_v43 = vadd.f32 %v3576_v44, %v3575_v20  ;;  %v3578_v45 = vpop.f32.mrb[70].mxu1  ;;  %v2778_v30 = vpop.permute.xlu1 %2777 }
 0x2f1   : > { %v3579_v25 = vpop.f32.mrb[71].mxu1 }
 0x2f2   : > { %2808 = vst [vmem:[%s4932_s10 + $0x8] sm:$0xff] %v2792_v6  ;;  %v2673_v47 = vadd.f32 %v3577_v43, %v4892_v9  ;;  %v3580_v40 = vadd.f32 %v3579_v25, %v3578_v45 }
 0x2f4   : > { %v2674_v48 = vadd.f32 %v3580_v40, %v4894_v1  ;;  %v2696_v24 = vadd.f32 %v4924_v63, %v2673_v47  ;;  %v2768_v1 = vpop.permute.xlu0 %2767 }
 0x2f6   : > { %v2793_v46 = vadd.f32 %v2764_v5, %v2696_v24  ;;  %v3581_v31 = vpop.f32.mrb[72].mxu1  ;;  %v2697_v12 = vadd.f32 %v4924_v63, %v2674_v48  ;;  %v2782_v24 = vpop.permute.xlu1 %2781 }
 0x2f7   : > { %v3582_v41 = vpop.f32.mrb[73].mxu1 }
 0x2f8   : > { %2809 = vst [vmem:[%s4932_s10 + $0x10] sm:$0xff] %v2793_v46  ;;  %v2794_v50 = vadd.f32 %v2766_v54, %v2697_v12  ;;  %v3583_v52 = vadd.f32 %v3582_v41, %v3581_v31  ;;  %v3584_v42 = vpop.f32.mrb[74].mxu1 }
 0x2f9   : > { %v3585_v35 = vpop.f32.mrb[75].mxu1 }
 0x2fa   : > { %2810 = vst [vmem:[%s4932_s10 + $0x18] sm:$0xff] %v2794_v50  ;;  %v2675_v9 = vadd.f32 %v3583_v52, %v4896_v19  ;;  %v3586_v38 = vadd.f32 %v3585_v35, %v3584_v42 }
 0x2fc   : > { %v2676_v60 = vadd.f32 %v3586_v38, %v4898_v37  ;;  %v2698_v7 = vadd.f32 %v4924_v63, %v2675_v9  ;;  %v2772_v37 = vpop.permute.xlu0 %2771 }
 0x2fe   : > { %v2795_v57 = vadd.f32 %v2768_v1, %v2698_v7  ;;  %v3587_v0 = vpop.f32.mrb[76].mxu1  ;;  %v2699_v14 = vadd.f32 %v4924_v63, %v2676_v60  ;;  %v2786_v1 = vpop.permute.xlu1 %2785 }
 0x2ff   : > { %v3588_v18 = vpop.f32.mrb[77].mxu1 }
 0x300   : > { %2811 = vst [vmem:[%s4932_s10 + $0x20] sm:$0xff] %v2795_v57  ;;  %v2796_v15 = vadd.f32 %v2770_v58, %v2699_v14  ;;  %v3589_v22 = vadd.f32 %v3588_v18, %v3587_v0  ;;  %v3590_v56 = vpop.f32.mrb[78].mxu1 }
 0x301   : > { %v3591_v17 = vpop.f32.mrb[79].mxu1 }
 0x302   : > { %2812 = vst [vmem:[%s4932_s10 + $0x28] sm:$0xff] %v2796_v15  ;;  %v2677_v19 = vadd.f32 %v3589_v22, %v4900_v11  ;;  %v3592_v59 = vadd.f32 %v3591_v17, %v3590_v56 }
 0x304   : > { %v2678_v21 = vadd.f32 %v3592_v59, %v4902_v49  ;;  %v2700_v51 = vadd.f32 %v4924_v63, %v2677_v19  ;;  %v2776_v49 = vpop.permute.xlu0 %2775  ;;  %v2790_v19 = vpop.permute.xlu1 %2789 }
 0x306   : > { %v2797_v2 = vadd.f32 %v2772_v37, %v2700_v51  ;;  %v3593_v27 = vpop.f32.mrb[80].mxu1  ;;  %v2701_v29 = vadd.f32 %v4924_v63, %v2678_v21 }
 0x307   : > { %v3594_v33 = vpop.f32.mrb[81].mxu1 }
 0x308   : > { %2813 = vst [vmem:[%s4932_s10 + $0x30] sm:$0xff] %v2797_v2  ;;  %v2798_v32 = vadd.f32 %v2774_v10, %v2701_v29  ;;  %v3595_v61 = vadd.f32 %v3594_v33, %v3593_v27  ;;  %v3596_v16 = vpop.f32.mrb[82].mxu1 }
 0x309   : > { %v3597_v55 = vpop.f32.mrb[83].mxu1 }
 0x30a   : > { %2814 = vst [vmem:[%s4932_s10 + $0x38] sm:$0xff] %v2798_v32  ;;  %v2679_v11 = vadd.f32 %v3595_v61, %v4904_v13  ;;  %v3598_v3 = vadd.f32 %v3597_v55, %v3596_v16 }
 0x30c   : > { %v2680_v34 = vadd.f32 %v3598_v3, %v4906_v62  ;;  %v2702_v26 = vadd.f32 %v4924_v63, %v2679_v11  ;;  %v2780_v62 = vpop.permute.xlu0 %2779 }
 0x30e   : > { %v2799_v20 = vadd.f32 %v2776_v49, %v2702_v26  ;;  %v3599_v39 = vpop.f32.mrb[84].mxu1  ;;  %v2703_v44 = vadd.f32 %v4924_v63, %v2680_v34 }
 0x30f   : > { %v3600_v6 = vpop.f32.mrb[85].mxu1 }
 0x310   : > { %2815 = vst [vmem:[%s4932_s10 + $0x40] sm:$0xff] %v2799_v20  ;;  %v2800_v43 = vadd.f32 %v2778_v30, %v2703_v44  ;;  %v3601_v45 = vadd.f32 %v3600_v6, %v3599_v39  ;;  %v3602_v25 = vpop.f32.mrb[86].mxu1 }
 0x311   : > { %v3603_v47 = vpop.f32.mrb[87].mxu1 }
 0x312   : > { %2816 = vst [vmem:[%s4932_s10 + $0x48] sm:$0xff] %v2800_v43  ;;  %v2681_v13 = vadd.f32 %v3601_v45, %v4908_v36  ;;  %v3604_v40 = vadd.f32 %v3603_v47, %v3602_v25 }
 0x314   : > { %v2682_v5 = vadd.f32 %v3604_v40, %v4910_v23  ;;  %v2704_v48 = vadd.f32 %v4924_v63, %v2681_v13  ;;  %v2784_v23 = vpop.permute.xlu0 %2783 }
 0x316   : > { %v2801_v54 = vadd.f32 %v2780_v62, %v2704_v48  ;;  %v3605_v46 = vpop.f32.mrb[88].mxu1  ;;  %v2705_v31 = vadd.f32 %v4924_v63, %v2682_v5 }
 0x317   : > { %v3606_v12 = vpop.f32.mrb[89].mxu1 }
 0x318   : > { %2817 = vst [vmem:[%s4932_s10 + $0x50] sm:$0xff] %v2801_v54  ;;  %v2802_v41 = vadd.f32 %v2782_v24, %v2705_v31  ;;  %v3607_v50 = vadd.f32 %v3606_v12, %v3605_v46  ;;  %v3608_v52 = vpop.f32.mrb[90].mxu1  ;;  %v2788_v22 = vpop.permute.xlu0 %2787 }
 0x319   : > { %v3609_v42 = vpop.f32.mrb[91].mxu1 }
 0x31a   : > { %2818 = vst [vmem:[%s4932_s10 + $0x58] sm:$0xff] %v2802_v41  ;;  %v2683_v36 = vadd.f32 %v3607_v50, %v4912_v8  ;;  %v3610_v35 = vadd.f32 %v3609_v42, %v3608_v52 }
 0x31c   : > { %v2684_v9 = vadd.f32 %v3610_v35, %v4914_v53  ;;  %v2706_v38 = vadd.f32 %v4924_v63, %v2683_v36 }
 0x31e   : > { %v2803_v60 = vadd.f32 %v2784_v23, %v2706_v38  ;;  %v3611_v7 = vpop.f32.mrb[92].mxu1  ;;  %v2707_v58 = vadd.f32 %v4924_v63, %v2684_v9 }
 0x31f   : > { %v3612_v57 = vpop.f32.mrb[93].mxu1 }
 0x320   : > { %2819 = vst [vmem:[%s4932_s10 + $0x60] sm:$0xff] %v2803_v60  ;;  %v2804_v0 = vadd.f32 %v2786_v1, %v2707_v58  ;;  %v3613_v14 = vadd.f32 %v3612_v57, %v3611_v7  ;;  %v3614_v18 = vpop.f32.mrb[94].mxu1 }
 0x321   : > { %v3615_v8 = vpop.f32.mrb[95].mxu1 }
 0x322   : > { %2820 = vst [vmem:[%s4932_s10 + $0x68] sm:$0xff] %v2804_v0  ;;  %v2685_v53 = vadd.f32 %v3613_v14, %v4916_v28  ;;  %v3616_v15 = vadd.f32 %v3615_v8, %v3614_v18 }
 0x324   : > { %v2686_v56 = vadd.f32 %v3616_v15, %v4918_v4  ;;  %v2708_v17 = vadd.f32 %v4924_v63, %v2685_v53 }
 0x326   : > { %v2805_v59 = vadd.f32 %v2788_v22, %v2708_v17  ;;  %v2709_v37 = vadd.f32 %v4924_v63, %v2686_v56 }
 0x328   : > { %2821 = vst [vmem:[%s4932_s10 + $0x70] sm:$0xff] %v2805_v59  ;;  %v2806_v28 = vadd.f32 %v2790_v19, %v2709_v37 }
 0x32a   : > { %2822 = vst [vmem:[%s4932_s10 + $0x78] sm:$0xff] %v2806_v28 }
 0x32b   : > { %3771 = shalt.err (!%p3768_p3)
}
 0x32c   : > { %s3772_s6 = scalar_lea.hbm %s4981_s15, 2048  ;;  %s3776_s16 = scalar_lea.hbm %s5035_s5, 4096 }
 0x32d   : > { %p3773_p4 = scmp.ne.s32.totalorder %s4981_s15, %s3772_s6  ;;  %p3777_p9 = scmp.lt.u32.totalorder %s4981_s15, %s5035_s5 }
 0x32e   : > { %p3778_p10 = scmp.lt.u32.totalorder %s3776_s16, %s3772_s6  ;;  %p3780_p12 = scmp.lt.u32.totalorder %s3772_s6, %s4981_s15 }
 0x32f   : > { %p3774_p7 = pnand %p3773_p4, %p3895_p5 }
 0x330   : > { %p3779_p11 = por %p3778_p10, %p3777_p9 }
 0x331   : > { %p3775_p8 = pneg %p3774_p7 }
 0x332   : > { %p3781_p13 = por %p3780_p12, %p3779_p11 }
 0x334   : > { %p3782_p0 = pnand %p3781_p13, %p3775_p8 }
 0x336   : > { %3785 = shalt.err (!%p3782_p0)
}
 0x337   : > { %s3825_s10 = smov 128   ;;  %s3826_s11 = smov 8  }
 0x338   : > { %3618 = dma.vmem_to_hbm [thread:$0]  (%p3895_p5), %s4983_s12, 2048, %s4981_s15, %s4989_s22, %s3825_s10, %s3825_s10, %s3826_s11  }
 0x339 PF: > { %p3624_p1 = scmp.ge.s32.totalorder %s3820_s21, 2  ;;  %s2852_s13 = sand.u32 1, %s3808_s18  }
 0x33a   : > { %s2853_s14 = scalar_lea.sflag [#allocation4], %s2852_s13 }
 0x33b   : > { %p3621_p2 = pnand %p3624_p1, %p3899_p6 }
 0x33d   : > { %3803 = dma.done.wait (!%p3621_p2), %s2853_s14, 2048  }
 0x33e   : > { %3805 = vsyncadd (!%p3621_p2), %s2853_s14, 4294965248  ;;  %p15_p3 = scmp.ge.s32.totalorder %s3882_s24, 4   ;;  %s5038_s18 = smov %s3812_s19 }
 0x33f   : > { %s5039_s19 = smov %s3816_s20  ;;  %s5040_s20 = smov %s3893_s27 }
 0x340   : > { %s5041_s21 = smov %s3882_s24  ;;  %17 = sbr.rel (!%p15_p3) target bundleno = 3 (0x3), region = 84 }
 0x347   :  { %2858 = vsyncpa [#allocation4], 1 }
 0x348   :  { %2860 = vsyncpa [#allocation4 + $0x1], 1 }

</bundles_post_ra>
